<compile_context>
chip_gen: v6e
topology: v6e:2x2x1
jax: 0.10.0
libtpu: 0.0.40
codegen_flags: <defaults>
</compile_context>

<pallas_src>
import functools

import jax
import jax.numpy as jnp
from jax.experimental import pallas as pl
from jax.experimental.pallas import tpu as pltpu


LANE = 128
# Scoped-VMEM budget: generous for v5e/v6e (128 MiB physical) yet still safe
# on v7x (64 MiB physical).  Worst-case working set here is < 10 MiB anyway.
_VMEM_LIMIT = 48 * 1024 * 1024


def _round_up(x, m):
    return ((x + m - 1) // m) * m


def _tile_m(m):
    """Row tile: multiple of 16 (bf16 sublane packing), capped at 512.

    Chosen so the 'parallel' M grid axis has >= 2 tiles whenever m allows it,
    so both v7x TensorCores get work (harmless no-op on single-TC v5e/v6e)."""
    if m <= 16:
        return 16
    if m <= 1024:
        return _round_up((m + 1) // 2, 16)
    return 512


def _tile_n(cout_pad):
    """Cout tile: up to 256 to fill the 256-wide MXU on v6e/v7x."""
    if cout_pad <= 256:
        return cout_pad
    if cout_pad % 256 == 0:
        return 256
    return LANE  # cout_pad is always a multiple of 128


def _tile_k(k):
    """Reduction tile: full K up to 2048, else the largest aligned chunk."""
    if k <= 2048:
        return k
    for t in (2048, 1024, 512, 256, 128):
        if k % t == 0:
            return t
    return k


# ----------------------------- Pallas kernels ------------------------------

def _conv_bias_act_kernel(p_ref, w_ref, b_ref, o_ref, acc_ref, *, apply_lrelu):
    """One (tm, tn) output tile of patches @ W, accumulated over K tiles.

    Epilogue (last K step): + bias, optional LeakyReLU(0.2), cast + store."""
    k = pl.program_id(2)

    @pl.when(k == 0)
    def _():
        acc_ref[...] = jnp.zeros_like(acc_ref)

    acc_ref[...] += jnp.dot(p_ref[...], w_ref[...],
                            preferred_element_type=jnp.float32)

    @pl.when(k == pl.num_programs(2) - 1)
    def _():
        y = acc_ref[...] + b_ref[...]
        if apply_lrelu:
            y = jnp.maximum(y, 0.2 * y)          # LeakyReLU(0.2), single VPU op
        o_ref[...] = y.astype(o_ref.dtype)


def _conv_stats_kernel(p_ref, w_ref, o_ref, sum_ref, sq_ref, acc_ref):
    """Conv matmul tile (no bias) that also emits per-tile channel sums and
    sums-of-squares for the fused BatchNorm statistics pass (f32)."""
    k = pl.program_id(2)

    @pl.when(k == 0)
    def _():
        acc_ref[...] = jnp.zeros_like(acc_ref)

    acc_ref[...] += jnp.dot(p_ref[...], w_ref[...],
                            preferred_element_type=jnp.float32)

    @pl.when(k == pl.num_programs(2) - 1)
    def _():
        acc = acc_ref[...]
        o_ref[...] = acc.astype(o_ref.dtype)
        sum_ref[...] = jnp.sum(acc, axis=0, keepdims=True)[None]
        sq_ref[...] = jnp.sum(acc * acc, axis=0, keepdims=True)[None]


# --------------------------- pallas_call wrappers ---------------------------

def conv_matmul_bias_act(patches, w_mat, bias, *, tm, apply_lrelu, out_dtype):
    m_pad, k = patches.shape
    cout_pad = w_mat.shape[1]
    tk, tn = _tile_k(k), _tile_n(cout_pad)
    grid = (m_pad // tm, cout_pad // tn, k // tk)
    return pl.pallas_call(
        functools.partial(_conv_bias_act_kernel, apply_lrelu=apply_lrelu),
        out_shape=jax.ShapeDtypeStruct((m_pad, cout_pad), out_dtype),
        grid_spec=pltpu.PrefetchScalarGridSpec(
            num_scalar_prefetch=0,
            grid=grid,
            in_specs=[
                pl.BlockSpec((tm, tk), lambda i, j, kk: (i, kk)),
                pl.BlockSpec((tk, tn), lambda i, j, kk: (kk, j)),
                pl.BlockSpec((1, tn), lambda i, j, kk: (0, j)),
            ],
            out_specs=pl.BlockSpec((tm, tn), lambda i, j, kk: (i, j)),
            scratch_shapes=[pltpu.VMEM((tm, tn), jnp.float32)],
        ),
        compiler_params=pltpu.CompilerParams(
            dimension_semantics=("parallel", "parallel", "arbitrary"),
            vmem_limit_bytes=_VMEM_LIMIT),
    )(patches, w_mat, bias)


def conv_matmul_stats(patches, w_mat, *, tm):
    m_pad, k = patches.shape
    cout_pad = w_mat.shape[1]
    tk, tn = _tile_k(k), _tile_n(cout_pad)
    mt = m_pad // tm
    grid = (mt, cout_pad // tn, k // tk)
    return pl.pallas_call(
        _conv_stats_kernel,
        out_shape=(jax.ShapeDtypeStruct((m_pad, cout_pad), jnp.bfloat16),
                   jax.ShapeDtypeStruct((mt, 1, cout_pad), jnp.float32),
                   jax.ShapeDtypeStruct((mt, 1, cout_pad), jnp.float32)),
        grid_spec=pltpu.PrefetchScalarGridSpec(
            num_scalar_prefetch=0,
            grid=grid,
            in_specs=[
                pl.BlockSpec((tm, tk), lambda i, j, kk: (i, kk)),
                pl.BlockSpec((tk, tn), lambda i, j, kk: (kk, j)),
            ],
            out_specs=(
                pl.BlockSpec((tm, tn), lambda i, j, kk: (i, j)),
                pl.BlockSpec((1, 1, tn), lambda i, j, kk: (i, 0, j)),
                pl.BlockSpec((1, 1, tn), lambda i, j, kk: (i, 0, j)),
            ),
            scratch_shapes=[pltpu.VMEM((tm, tn), jnp.float32)],
        ),
        compiler_params=pltpu.CompilerParams(
            dimension_semantics=("parallel", "parallel", "arbitrary"),
            vmem_limit_bytes=_VMEM_LIMIT),
    )(patches, w_mat)


# ------------------------------- JAX glue ----------------------------------

def _im2col(x_nhwc, kh, kw, stride, pad):
    """Conv patches, (N*Ho*Wo, kh*kw*Cin) in bf16, tap-major / Cin-minor order."""
    # TODO(synk): fold the 4x4 taps into the Pallas kernel (overlapping input
    # windows / manual halo DMA) to avoid materializing im2col in HBM.
    n, h, w, c = x_nhwc.shape
    xp = jnp.pad(x_nhwc, ((0, 0), (pad, pad), (pad, pad), (0, 0)))
    ho = (h + 2 * pad - kh) // stride + 1
    wo = (w + 2 * pad - kw) // stride + 1
    cols = []
    for i in range(kh):
        for j in range(kw):
            cols.append(xp[:, i:i + stride * ho:stride, j:j + stride * wo:stride, :])
    patches = jnp.stack(cols, axis=3).reshape(n * ho * wo, kh * kw * c)
    return patches, ho, wo


def _w_to_mat(w_oihw, cout_pad):
    """(Cout, Cin, kh, kw) -> (kh*kw*Cin, cout_pad) bf16, zero-padded columns."""
    cout, cin, kh, kw = w_oihw.shape
    w_mat = jnp.transpose(w_oihw, (2, 3, 1, 0)).reshape(kh * kw * cin, cout)
    if cout_pad != cout:
        w_mat = jnp.pad(w_mat, ((0, 0), (0, cout_pad - cout)))
    return w_mat.astype(jnp.bfloat16)


def _pad_cols(v_1xc, cout_pad):
    c = v_1xc.shape[1]
    if cout_pad != c:
        v_1xc = jnp.pad(v_1xc, ((0, 0), (0, cout_pad - c)))
    return v_1xc.astype(jnp.float32)


def _conv_layer(x_nhwc, pending, layer):
    """One conv block.  `pending` is an optional (scale, shift) from the
    previous BatchNorm layer, applied lazily here (fused by XLA with the
    im2col gather) so no standalone BN-apply pass touches HBM."""
    w = layer["w"]
    cout = w.shape[0]
    cout_pad = _round_up(cout, LANE)
    n = x_nhwc.shape[0]

    if pending is not None:
        scale, shift = pending
        z = x_nhwc.astype(jnp.float32) * scale + shift
        x_nhwc = jnp.maximum(z, 0.2 * z)          # BN + LeakyReLU(0.2)

    patches, ho, wo = _im2col(x_nhwc.astype(jnp.bfloat16), 4, 4,
                              layer["stride"], 1)
    m = patches.shape[0]
    tm = _tile_m(m)
    m_pad = _round_up(m, tm)
    if m_pad != m:
        patches = jnp.pad(patches, ((0, m_pad - m), (0, 0)))
    w_mat = _w_to_mat(w, cout_pad)

    if layer["kind"] in ("conv_lrelu", "conv"):
        is_final = layer["kind"] == "conv"
        y = conv_matmul_bias_act(
            patches, w_mat, _pad_cols(layer["b"], cout_pad), tm=tm,
            apply_lrelu=not is_final,
            out_dtype=jnp.float32 if is_final else jnp.bfloat16)
        pending_out = None
    else:  # conv_bn_lrelu (bias=False in PyTorch)
        y, sums, sqs = conv_matmul_stats(patches, w_mat, tm=tm)
        # Padded rows are exactly zero (no bias), so they contribute nothing;
        # divide by the true row count m.  Biased variance (PyTorch train BN).
        s = jnp.sum(sums, axis=(0, 1))[:cout]
        sq = jnp.sum(sqs, axis=(0, 1))[:cout]
        mean = s / float(m)
        var = jnp.maximum(sq / float(m) - mean * mean, 0.0)
        inv = jax.lax.rsqrt(var + 1e-5)
        scale = layer["gamma"][0] * inv
        shift = layer["beta"][0] - mean * scale
        pending_out = (scale, shift)   # applied (with LeakyReLU) by the next layer

    y = y[:m, :cout].reshape(n, ho, wo, cout)
    return y, pending_out


def init_params(key, input_nc, ndf=64, n_layers=3):
    """Deterministic synthetic params, shapes identical to NLayerDiscriminator."""
    kw_ = 4
    keys = jax.random.split(key, 2 * (n_layers + 2))
    ki = 0

    def conv_w(cout, cin):
        nonlocal ki
        w = 0.02 * jax.random.normal(keys[ki], (cout, cin, kw_, kw_), jnp.float32)
        ki += 1
        return w

    def conv_b(cout):
        nonlocal ki
        b = 0.02 * jax.random.normal(keys[ki], (1, cout), jnp.float32)
        ki += 1
        return b

    layers = []
    layers.append(dict(kind="conv_lrelu", stride=2,
                       w=conv_w(ndf, input_nc), b=conv_b(ndf)))
    nf_mult = 1
    for n in range(1, n_layers):
        nf_prev, nf_mult = nf_mult, min(2 ** n, 8)
        cout = ndf * nf_mult
        layers.append(dict(kind="conv_bn_lrelu", stride=2,
                           w=conv_w(cout, ndf * nf_prev),
                           gamma=jnp.ones((1, cout), jnp.float32),
                           beta=jnp.zeros((1, cout), jnp.float32)))
    nf_prev, nf_mult = nf_mult, min(2 ** n_layers, 8)
    cout = ndf * nf_mult
    layers.append(dict(kind="conv_bn_lrelu", stride=1,
                       w=conv_w(cout, ndf * nf_prev),
                       gamma=jnp.ones((1, cout), jnp.float32),
                       beta=jnp.zeros((1, cout), jnp.float32)))
    layers.append(dict(kind="conv", stride=1, w=conv_w(1, cout), b=conv_b(1)))
    return layers


def nlayer_discriminator_forward(x_nchw, layers):
    x = jnp.transpose(x_nchw, (0, 2, 3, 1)).astype(jnp.float32)  # NCHW -> NHWC
    pending = None
    for layer in layers:
        x, pending = _conv_layer(x, pending, layer)
    # Final layer is a plain conv, so no BatchNorm is left pending here.
    return jnp.transpose(x, (0, 3, 1, 2))  # back to NCHW (f32 logits)
    # TODO(synk): BatchNorm2d running_mean/running_var updates (training-time
    # state mutation) are not represented; forward uses batch stats as PyTorch
    # train mode does.


if __name__ == "__main__":
    key = jax.random.PRNGKey(0)
    kx, kp = jax.random.split(key)

    # batch=2, input_nc=4, spatial=32 (smallest that keeps the stride-1 4x4
    # convs with positive spatial extent), ndf=8, n_layers=3.
    N, C, H, W = 2, 4, 32, 32
    ndf, n_layers = 8, 3

    x = jax.random.normal(kx, (N, C, H, W), jnp.float32)
    params = init_params(kp, input_nc=C, ndf=ndf, n_layers=n_layers)

    fwd = jax.jit(lambda xx: nlayer_discriminator_forward(xx, params))
    out = fwd(x)
    jax.block_until_ready(out)

    # 32 -> 16 -> 8 -> 4 (three stride-2 convs) -> 3 (stride-1) -> 2 (final)
    assert out.shape == (N, 1, 2, 2), out.shape
    assert jnp.isfinite(out).all()
    print("KERNEL_OK")
</pallas_src>

<mosaic_0001>
module attributes {stable_mosaic.version = 11 : i64} {
  func.func @_conv_bias_act_kernel(%arg0: i32, %arg1: i32, %arg2: i32, %arg3: memref<256x64xbf16, #tpu.memory_space<vmem>>, %arg4: memref<64x128xbf16, #tpu.memory_space<vmem>>, %arg5: memref<1x128xf32, #tpu.memory_space<vmem>>, %arg6: memref<256x128xbf16, #tpu.memory_space<vmem>>, %arg7: memref<256x128xf32, #tpu.memory_space<vmem>>) attributes {dimension_semantics = [#tpu.dimension_semantics<parallel>, #tpu.dimension_semantics<parallel>, #tpu.dimension_semantics<arbitrary>], iteration_bounds = array<i64: 2, 1, 1>, scalar_prefetch = 0 : i64, scratch_operands = 1 : i64, tpu.core_type = #tpu.core_type<tc>, window_params = [{transform_indices = @transform_0, window_bounds = array<i64: 256, 64>}, {transform_indices = @transform_1, window_bounds = array<i64: 64, 128>}, {transform_indices = @transform_2, window_bounds = array<i64: 1, 128>}, {transform_indices = @transform_3, window_bounds = array<i64: 256, 128>}]} {
    %c0_i32 = arith.constant 0 : i32
    %0 = arith.cmpi eq, %arg2, %c0_i32 : i32
    %1 = arith.extui %0 : i1 to i32
    %c0_i32_0 = arith.constant 0 : i32
    %2 = arith.cmpi ne, %1, %c0_i32_0 : i32
    scf.if %2 {
      %cst_10 = arith.constant 0.000000e+00 : f32
      %12 = vector.broadcast %cst_10 : f32 to vector<256x128xf32>
      %c0_11 = arith.constant 0 : index
      %c0_12 = arith.constant 0 : index
      %13 = vector.load %arg7[%c0_11, %c0_12] : memref<256x128xf32, #tpu.memory_space<vmem>>, vector<256x128xf32>
      tpu.vector_store %arg7[%c0_11, %c0_12], %12 {strides = array<i32>} : memref<256x128xf32, #tpu.memory_space<vmem>>, vector<256x128xf32>,
    } else {
    }
    %c0 = arith.constant 0 : index
    %c0_1 = arith.constant 0 : index
    %3 = vector.load %arg7[%c0, %c0_1] : memref<256x128xf32, #tpu.memory_space<vmem>>, vector<256x128xf32>
    %c0_2 = arith.constant 0 : index
    %c0_3 = arith.constant 0 : index
    %4 = vector.load %arg3[%c0_2, %c0_3] : memref<256x64xbf16, #tpu.memory_space<vmem>>, vector<256x64xbf16>
    %c0_4 = arith.constant 0 : index
    %c0_5 = arith.constant 0 : index
    %5 = vector.load %arg4[%c0_4, %c0_5] : memref<64x128xbf16, #tpu.memory_space<vmem>>, vector<64x128xbf16>
    %cst = arith.constant dense<0.000000e+00> : vector<256x128xf32>
    %6 = tpu.matmul %4, %5, %cst {dimension_numbers = #tpu.dot_dimension_numbers<[1], [0], [0], [1], [0, 0, 1, 1], [], []>} : vector<256x64xbf16>, vector<64x128xbf16>, vector<256x128xf32> -> vector<256x128xf32>
    %7 = arith.addf %3, %6 : vector<256x128xf32>
    %c0_6 = arith.constant 0 : index
    %c0_7 = arith.constant 0 : index
    %8 = vector.load %arg7[%c0_6, %c0_7] : memref<256x128xf32, #tpu.memory_space<vmem>>, vector<256x128xf32>
    tpu.vector_store %arg7[%c0_6, %c0_7], %7 {strides = array<i32>} : memref<256x128xf32, #tpu.memory_space<vmem>>, vector<256x128xf32>,
    %c0_i32_8 = arith.constant 0 : i32
    %9 = arith.cmpi eq, %arg2, %c0_i32_8 : i32
    %10 = arith.extui %9 : i1 to i32
    %c0_i32_9 = arith.constant 0 : i32
    %11 = arith.cmpi ne, %10, %c0_i32_9 : i32
    scf.if %11 {
      %c0_10 = arith.constant 0 : index
      %c0_11 = arith.constant 0 : index
      %12 = vector.load %arg7[%c0_10, %c0_11] : memref<256x128xf32, #tpu.memory_space<vmem>>, vector<256x128xf32>
      %c0_12 = arith.constant 0 : index
      %c0_13 = arith.constant 0 : index
      %13 = vector.load %arg5[%c0_12, %c0_13] : memref<1x128xf32, #tpu.memory_space<vmem>>, vector<1x128xf32>
      %14 = vector.broadcast %13 : vector<1x128xf32> to vector<256x128xf32>
      %15 = arith.addf %12, %14 : vector<256x128xf32>
      %cst_14 = arith.constant 2.000000e-01 : f32
      %16 = vector.broadcast %cst_14 : f32 to vector<256x128xf32>
      %17 = arith.mulf %16, %15 : vector<256x128xf32>
      %18 = arith.maximumf %15, %17 : vector<256x128xf32>
      %19 = arith.truncf %18 : vector<256x128xf32> to vector<256x128xbf16>
      %c0_15 = arith.constant 0 : index
      %c0_16 = arith.constant 0 : index
      %20 = vector.load %arg6[%c0_15, %c0_16] : memref<256x128xbf16, #tpu.memory_space<vmem>>, vector<256x128xbf16>
      tpu.vector_store %arg6[%c0_15, %c0_16], %19 {strides = array<i32>} : memref<256x128xbf16, #tpu.memory_space<vmem>>, vector<256x128xbf16>,
    } else {
    }
    return
  }
  func.func @transform_0(%arg0: i32, %arg1: i32, %arg2: i32) -> (i32, i32) {
    %c0_i32 = arith.constant 0 : i32
    return %arg0, %arg2 : i32, i32
  }
  func.func @transform_1(%arg0: i32, %arg1: i32, %arg2: i32) -> (i32, i32) {
    %c0_i32 = arith.constant 0 : i32
    return %arg2, %arg1 : i32, i32
  }
  func.func @transform_2(%arg0: i32, %arg1: i32, %arg2: i32) -> (i32, i32) {
    %c0_i32 = arith.constant 0 : i32
    %c0_i32_0 = arith.constant 0 : i32
    return %c0_i32, %arg1 : i32, i32
  }
  func.func @transform_3(%arg0: i32, %arg1: i32, %arg2: i32) -> (i32, i32) {
    %c0_i32 = arith.constant 0 : i32
    return %arg0, %arg1 : i32, i32
  }
}

module attributes {stable_mosaic.version = 11 : i64} {
  func.func @_conv_stats_kernel(%arg0: i32, %arg1: i32, %arg2: i32, %arg3: memref<64x128xbf16, #tpu.memory_space<vmem>>, %arg4: memref<128x128xbf16, #tpu.memory_space<vmem>>, %arg5: memref<64x128xbf16, #tpu.memory_space<vmem>>, %arg6: memref<1x1x128xf32, #tpu.memory_space<vmem>>, %arg7: memref<1x1x128xf32, #tpu.memory_space<vmem>>, %arg8: memref<64x128xf32, #tpu.memory_space<vmem>>) attributes {dimension_semantics = [#tpu.dimension_semantics<parallel>, #tpu.dimension_semantics<parallel>, #tpu.dimension_semantics<arbitrary>], iteration_bounds = array<i64: 2, 1, 1>, scalar_prefetch = 0 : i64, scratch_operands = 1 : i64, tpu.core_type = #tpu.core_type<tc>, window_params = [{transform_indices = @transform_0, window_bounds = array<i64: 64, 128>}, {transform_indices = @transform_1, window_bounds = array<i64: 128, 128>}, {transform_indices = @transform_2, window_bounds = array<i64: 64, 128>}, {transform_indices = @transform_3, window_bounds = array<i64: 1, 1, 128>}, {transform_indices = @transform_4, window_bounds = array<i64: 1, 1, 128>}]} {
    %c0_i32 = arith.constant 0 : i32
    %0 = arith.cmpi eq, %arg2, %c0_i32 : i32
    %1 = arith.extui %0 : i1 to i32
    %c0_i32_0 = arith.constant 0 : i32
    %2 = arith.cmpi ne, %1, %c0_i32_0 : i32
    scf.if %2 {
      %cst_10 = arith.constant 0.000000e+00 : f32
      %12 = vector.broadcast %cst_10 : f32 to vector<64x128xf32>
      %c0_11 = arith.constant 0 : index
      %c0_12 = arith.constant 0 : index
      %13 = vector.load %arg8[%c0_11, %c0_12] : memref<64x128xf32, #tpu.memory_space<vmem>>, vector<64x128xf32>
      tpu.vector_store %arg8[%c0_11, %c0_12], %12 {strides = array<i32>} : memref<64x128xf32, #tpu.memory_space<vmem>>, vector<64x128xf32>,
    } else {
    }
    %c0 = arith.constant 0 : index
    %c0_1 = arith.constant 0 : index
    %3 = vector.load %arg8[%c0, %c0_1] : memref<64x128xf32, #tpu.memory_space<vmem>>, vector<64x128xf32>
    %c0_2 = arith.constant 0 : index
    %c0_3 = arith.constant 0 : index
    %4 = vector.load %arg3[%c0_2, %c0_3] : memref<64x128xbf16, #tpu.memory_space<vmem>>, vector<64x128xbf16>
    %c0_4 = arith.constant 0 : index
    %c0_5 = arith.constant 0 : index
    %5 = vector.load %arg4[%c0_4, %c0_5] : memref<128x128xbf16, #tpu.memory_space<vmem>>, vector<128x128xbf16>
    %cst = arith.constant dense<0.000000e+00> : vector<64x128xf32>
    %6 = tpu.matmul %4, %5, %cst {dimension_numbers = #tpu.dot_dimension_numbers<[1], [0], [0], [1], [0, 0, 1, 1], [], []>} : vector<64x128xbf16>, vector<128x128xbf16>, vector<64x128xf32> -> vector<64x128xf32>
    %7 = arith.addf %3, %6 : vector<64x128xf32>
    %c0_6 = arith.constant 0 : index
    %c0_7 = arith.constant 0 : index
    %8 = vector.load %arg8[%c0_6, %c0_7] : memref<64x128xf32, #tpu.memory_space<vmem>>, vector<64x128xf32>
    tpu.vector_store %arg8[%c0_6, %c0_7], %7 {strides = array<i32>} : memref<64x128xf32, #tpu.memory_space<vmem>>, vector<64x128xf32>,
    %c0_i32_8 = arith.constant 0 : i32
    %9 = arith.cmpi eq, %arg2, %c0_i32_8 : i32
    %10 = arith.extui %9 : i1 to i32
    %c0_i32_9 = arith.constant 0 : i32
    %11 = arith.cmpi ne, %10, %c0_i32_9 : i32
    scf.if %11 {
      %c0_10 = arith.constant 0 : index
      %c0_11 = arith.constant 0 : index
      %12 = vector.load %arg8[%c0_10, %c0_11] : memref<64x128xf32, #tpu.memory_space<vmem>>, vector<64x128xf32>
      %13 = arith.truncf %12 : vector<64x128xf32> to vector<64x128xbf16>
      %c0_12 = arith.constant 0 : index
      %c0_13 = arith.constant 0 : index
      %14 = vector.load %arg5[%c0_12, %c0_13] : memref<64x128xbf16, #tpu.memory_space<vmem>>, vector<64x128xbf16>
      tpu.vector_store %arg5[%c0_12, %c0_13], %13 {strides = array<i32>} : memref<64x128xbf16, #tpu.memory_space<vmem>>, vector<64x128xbf16>,
      %cst_14 = arith.constant dense<0.000000e+00> : vector<128xf32>
      %15 = vector.multi_reduction <add>, %12, %cst_14 [0] : vector<64x128xf32> to vector<128xf32>
      %16 = vector.shape_cast %15 : vector<128xf32> to vector<1x128xf32>
      %17 = vector.shape_cast %16 : vector<1x128xf32> to vector<1x1x128xf32>
      %c0_15 = arith.constant 0 : index
      %c0_16 = arith.constant 0 : index
      %c0_17 = arith.constant 0 : index
      %18 = vector.load %arg6[%c0_15, %c0_16, %c0_17] : memref<1x1x128xf32, #tpu.memory_space<vmem>>, vector<1x1x128xf32>
      tpu.vector_store %arg6[%c0_15, %c0_16, %c0_17], %17 {strides = array<i32>} : memref<1x1x128xf32, #tpu.memory_space<vmem>>, vector<1x1x128xf32>,
      %19 = arith.mulf %12, %12 : vector<64x128xf32>
      %cst_18 = arith.constant dense<0.000000e+00> : vector<128xf32>
      %20 = vector.multi_reduction <add>, %19, %cst_18 [0] : vector<64x128xf32> to vector<128xf32>
      %21 = vector.shape_cast %20 : vector<128xf32> to vector<1x128xf32>
      %22 = vector.shape_cast %21 : vector<1x128xf32> to vector<1x1x128xf32>
      %c0_19 = arith.constant 0 : index
      %c0_20 = arith.constant 0 : index
      %c0_21 = arith.constant 0 : index
      %23 = vector.load %arg7[%c0_19, %c0_20, %c0_21] : memref<1x1x128xf32, #tpu.memory_space<vmem>>, vector<1x1x128xf32>
      tpu.vector_store %arg7[%c0_19, %c0_20, %c0_21], %22 {strides = array<i32>} : memref<1x1x128xf32, #tpu.memory_space<vmem>>, vector<1x1x128xf32>,
    } else {
    }
    return
  }
  func.func @transform_0(%arg0: i32, %arg1: i32, %arg2: i32) -> (i32, i32) {
    %c0_i32 = arith.constant 0 : i32
    return %arg0, %arg2 : i32, i32
  }
  func.func @transform_1(%arg0: i32, %arg1: i32, %arg2: i32) -> (i32, i32) {
    %c0_i32 = arith.constant 0 : i32
    return %arg2, %arg1 : i32, i32
  }
  func.func @transform_2(%arg0: i32, %arg1: i32, %arg2: i32) -> (i32, i32) {
    %c0_i32 = arith.constant 0 : i32
    return %arg0, %arg1 : i32, i32
  }
  func.func @transform_3(%arg0: i32, %arg1: i32, %arg2: i32) -> (i32, i32, i32) {
    %c0_i32 = arith.constant 0 : i32
    %c0_i32_0 = arith.constant 0 : i32
    return %arg0, %c0_i32, %arg1 : i32, i32, i32
  }
  func.func @transform_4(%arg0: i32, %arg1: i32, %arg2: i32) -> (i32, i32, i32) {
    %c0_i32 = arith.constant 0 : i32
    %c0_i32_0 = arith.constant 0 : i32
    return %arg0, %c0_i32, %arg1 : i32, i32, i32
  }
}

module attributes {stable_mosaic.version = 11 : i64} {
  func.func @_conv_stats_kernel(%arg0: i32, %arg1: i32, %arg2: i32, %arg3: memref<16x256xbf16, #tpu.memory_space<vmem>>, %arg4: memref<256x128xbf16, #tpu.memory_space<vmem>>, %arg5: memref<16x128xbf16, #tpu.memory_space<vmem>>, %arg6: memref<1x1x128xf32, #tpu.memory_space<vmem>>, %arg7: memref<1x1x128xf32, #tpu.memory_space<vmem>>, %arg8: memref<16x128xf32, #tpu.memory_space<vmem>>) attributes {dimension_semantics = [#tpu.dimension_semantics<parallel>, #tpu.dimension_semantics<parallel>, #tpu.dimension_semantics<arbitrary>], iteration_bounds = array<i64: 2, 1, 1>, scalar_prefetch = 0 : i64, scratch_operands = 1 : i64, tpu.core_type = #tpu.core_type<tc>, window_params = [{transform_indices = @transform_0, window_bounds = array<i64: 16, 256>}, {transform_indices = @transform_1, window_bounds = array<i64: 256, 128>}, {transform_indices = @transform_2, window_bounds = array<i64: 16, 128>}, {transform_indices = @transform_3, window_bounds = array<i64: 1, 1, 128>}, {transform_indices = @transform_4, window_bounds = array<i64: 1, 1, 128>}]} {
    %c0_i32 = arith.constant 0 : i32
    %0 = arith.cmpi eq, %arg2, %c0_i32 : i32
    %1 = arith.extui %0 : i1 to i32
    %c0_i32_0 = arith.constant 0 : i32
    %2 = arith.cmpi ne, %1, %c0_i32_0 : i32
    scf.if %2 {
      %cst_10 = arith.constant 0.000000e+00 : f32
      %12 = vector.broadcast %cst_10 : f32 to vector<16x128xf32>
      %c0_11 = arith.constant 0 : index
      %c0_12 = arith.constant 0 : index
      %13 = vector.load %arg8[%c0_11, %c0_12] : memref<16x128xf32, #tpu.memory_space<vmem>>, vector<16x128xf32>
      tpu.vector_store %arg8[%c0_11, %c0_12], %12 {strides = array<i32>} : memref<16x128xf32, #tpu.memory_space<vmem>>, vector<16x128xf32>,
    } else {
    }
    %c0 = arith.constant 0 : index
    %c0_1 = arith.constant 0 : index
    %3 = vector.load %arg8[%c0, %c0_1] : memref<16x128xf32, #tpu.memory_space<vmem>>, vector<16x128xf32>
    %c0_2 = arith.constant 0 : index
    %c0_3 = arith.constant 0 : index
    %4 = vector.load %arg3[%c0_2, %c0_3] : memref<16x256xbf16, #tpu.memory_space<vmem>>, vector<16x256xbf16>
    %c0_4 = arith.constant 0 : index
    %c0_5 = arith.constant 0 : index
    %5 = vector.load %arg4[%c0_4, %c0_5] : memref<256x128xbf16, #tpu.memory_space<vmem>>, vector<256x128xbf16>
    %cst = arith.constant dense<0.000000e+00> : vector<16x128xf32>
    %6 = tpu.matmul %4, %5, %cst {dimension_numbers = #tpu.dot_dimension_numbers<[1], [0], [0], [1], [0, 0, 1, 1], [], []>} : vector<16x256xbf16>, vector<256x128xbf16>, vector<16x128xf32> -> vector<16x128xf32>
    %7 = arith.addf %3, %6 : vector<16x128xf32>
    %c0_6 = arith.constant 0 : index
    %c0_7 = arith.constant 0 : index
    %8 = vector.load %arg8[%c0_6, %c0_7] : memref<16x128xf32, #tpu.memory_space<vmem>>, vector<16x128xf32>
    tpu.vector_store %arg8[%c0_6, %c0_7], %7 {strides = array<i32>} : memref<16x128xf32, #tpu.memory_space<vmem>>, vector<16x128xf32>,
    %c0_i32_8 = arith.constant 0 : i32
    %9 = arith.cmpi eq, %arg2, %c0_i32_8 : i32
    %10 = arith.extui %9 : i1 to i32
    %c0_i32_9 = arith.constant 0 : i32
    %11 = arith.cmpi ne, %10, %c0_i32_9 : i32
    scf.if %11 {
      %c0_10 = arith.constant 0 : index
      %c0_11 = arith.constant 0 : index
      %12 = vector.load %arg8[%c0_10, %c0_11] : memref<16x128xf32, #tpu.memory_space<vmem>>, vector<16x128xf32>
      %13 = arith.truncf %12 : vector<16x128xf32> to vector<16x128xbf16>
      %c0_12 = arith.constant 0 : index
      %c0_13 = arith.constant 0 : index
      %14 = vector.load %arg5[%c0_12, %c0_13] : memref<16x128xbf16, #tpu.memory_space<vmem>>, vector<16x128xbf16>
      tpu.vector_store %arg5[%c0_12, %c0_13], %13 {strides = array<i32>} : memref<16x128xbf16, #tpu.memory_space<vmem>>, vector<16x128xbf16>,
      %cst_14 = arith.constant dense<0.000000e+00> : vector<128xf32>
      %15 = vector.multi_reduction <add>, %12, %cst_14 [0] : vector<16x128xf32> to vector<128xf32>
      %16 = vector.shape_cast %15 : vector<128xf32> to vector<1x128xf32>
      %17 = vector.shape_cast %16 : vector<1x128xf32> to vector<1x1x128xf32>
      %c0_15 = arith.constant 0 : index
      %c0_16 = arith.constant 0 : index
      %c0_17 = arith.constant 0 : index
      %18 = vector.load %arg6[%c0_15, %c0_16, %c0_17] : memref<1x1x128xf32, #tpu.memory_space<vmem>>, vector<1x1x128xf32>
      tpu.vector_store %arg6[%c0_15, %c0_16, %c0_17], %17 {strides = array<i32>} : memref<1x1x128xf32, #tpu.memory_space<vmem>>, vector<1x1x128xf32>,
      %19 = arith.mulf %12, %12 : vector<16x128xf32>
      %cst_18 = arith.constant dense<0.000000e+00> : vector<128xf32>
      %20 = vector.multi_reduction <add>, %19, %cst_18 [0] : vector<16x128xf32> to vector<128xf32>
      %21 = vector.shape_cast %20 : vector<128xf32> to vector<1x128xf32>
      %22 = vector.shape_cast %21 : vector<1x128xf32> to vector<1x1x128xf32>
      %c0_19 = arith.constant 0 : index
      %c0_20 = arith.constant 0 : index
      %c0_21 = arith.constant 0 : index
      %23 = vector.load %arg7[%c0_19, %c0_20, %c0_21] : memref<1x1x128xf32, #tpu.memory_space<vmem>>, vector<1x1x128xf32>
      tpu.vector_store %arg7[%c0_19, %c0_20, %c0_21], %22 {strides = array<i32>} : memref<1x1x128xf32, #tpu.memory_space<vmem>>, vector<1x1x128xf32>,
    } else {
    }
    return
  }
  func.func @transform_0(%arg0: i32, %arg1: i32, %arg2: i32) -> (i32, i32) {
    %c0_i32 = arith.constant 0 : i32
    return %arg0, %arg2 : i32, i32
  }
  func.func @transform_1(%arg0: i32, %arg1: i32, %arg2: i32) -> (i32, i32) {
    %c0_i32 = arith.constant 0 : i32
    return %arg2, %arg1 : i32, i32
  }
  func.func @transform_2(%arg0: i32, %arg1: i32, %arg2: i32) -> (i32, i32) {
    %c0_i32 = arith.constant 0 : i32
    return %arg0, %arg1 : i32, i32
  }
  func.func @transform_3(%arg0: i32, %arg1: i32, %arg2: i32) -> (i32, i32, i32) {
    %c0_i32 = arith.constant 0 : i32
    %c0_i32_0 = arith.constant 0 : i32
    return %arg0, %c0_i32, %arg1 : i32, i32, i32
  }
  func.func @transform_4(%arg0: i32, %arg1: i32, %arg2: i32) -> (i32, i32, i32) {
    %c0_i32 = arith.constant 0 : i32
    %c0_i32_0 = arith.constant 0 : i32
    return %arg0, %c0_i32, %arg1 : i32, i32, i32
  }
}

module attributes {stable_mosaic.version = 11 : i64} {
  func.func @_conv_stats_kernel(%arg0: i32, %arg1: i32, %arg2: i32, %arg3: memref<16x512xbf16, #tpu.memory_space<vmem>>, %arg4: memref<512x128xbf16, #tpu.memory_space<vmem>>, %arg5: memref<16x128xbf16, #tpu.memory_space<vmem>>, %arg6: memref<1x1x128xf32, #tpu.memory_space<vmem>>, %arg7: memref<1x1x128xf32, #tpu.memory_space<vmem>>, %arg8: memref<16x128xf32, #tpu.memory_space<vmem>>) attributes {dimension_semantics = [#tpu.dimension_semantics<parallel>, #tpu.dimension_semantics<parallel>, #tpu.dimension_semantics<arbitrary>], iteration_bounds = array<i64: 2, 1, 1>, scalar_prefetch = 0 : i64, scratch_operands = 1 : i64, tpu.core_type = #tpu.core_type<tc>, window_params = [{transform_indices = @transform_0, window_bounds = array<i64: 16, 512>}, {transform_indices = @transform_1, window_bounds = array<i64: 512, 128>}, {transform_indices = @transform_2, window_bounds = array<i64: 16, 128>}, {transform_indices = @transform_3, window_bounds = array<i64: 1, 1, 128>}, {transform_indices = @transform_4, window_bounds = array<i64: 1, 1, 128>}]} {
    %c0_i32 = arith.constant 0 : i32
    %0 = arith.cmpi eq, %arg2, %c0_i32 : i32
    %1 = arith.extui %0 : i1 to i32
    %c0_i32_0 = arith.constant 0 : i32
    %2 = arith.cmpi ne, %1, %c0_i32_0 : i32
    scf.if %2 {
      %cst_10 = arith.constant 0.000000e+00 : f32
      %12 = vector.broadcast %cst_10 : f32 to vector<16x128xf32>
      %c0_11 = arith.constant 0 : index
      %c0_12 = arith.constant 0 : index
      %13 = vector.load %arg8[%c0_11, %c0_12] : memref<16x128xf32, #tpu.memory_space<vmem>>, vector<16x128xf32>
      tpu.vector_store %arg8[%c0_11, %c0_12], %12 {strides = array<i32>} : memref<16x128xf32, #tpu.memory_space<vmem>>, vector<16x128xf32>,
    } else {
    }
    %c0 = arith.constant 0 : index
    %c0_1 = arith.constant 0 : index
    %3 = vector.load %arg8[%c0, %c0_1] : memref<16x128xf32, #tpu.memory_space<vmem>>, vector<16x128xf32>
    %c0_2 = arith.constant 0 : index
    %c0_3 = arith.constant 0 : index
    %4 = vector.load %arg3[%c0_2, %c0_3] : memref<16x512xbf16, #tpu.memory_space<vmem>>, vector<16x512xbf16>
    %c0_4 = arith.constant 0 : index
    %c0_5 = arith.constant 0 : index
    %5 = vector.load %arg4[%c0_4, %c0_5] : memref<512x128xbf16, #tpu.memory_space<vmem>>, vector<512x128xbf16>
    %cst = arith.constant dense<0.000000e+00> : vector<16x128xf32>
    %6 = tpu.matmul %4, %5, %cst {dimension_numbers = #tpu.dot_dimension_numbers<[1], [0], [0], [1], [0, 0, 1, 1], [], []>} : vector<16x512xbf16>, vector<512x128xbf16>, vector<16x128xf32> -> vector<16x128xf32>
    %7 = arith.addf %3, %6 : vector<16x128xf32>
    %c0_6 = arith.constant 0 : index
    %c0_7 = arith.constant 0 : index
    %8 = vector.load %arg8[%c0_6, %c0_7] : memref<16x128xf32, #tpu.memory_space<vmem>>, vector<16x128xf32>
    tpu.vector_store %arg8[%c0_6, %c0_7], %7 {strides = array<i32>} : memref<16x128xf32, #tpu.memory_space<vmem>>, vector<16x128xf32>,
    %c0_i32_8 = arith.constant 0 : i32
    %9 = arith.cmpi eq, %arg2, %c0_i32_8 : i32
    %10 = arith.extui %9 : i1 to i32
    %c0_i32_9 = arith.constant 0 : i32
    %11 = arith.cmpi ne, %10, %c0_i32_9 : i32
    scf.if %11 {
      %c0_10 = arith.constant 0 : index
      %c0_11 = arith.constant 0 : index
      %12 = vector.load %arg8[%c0_10, %c0_11] : memref<16x128xf32, #tpu.memory_space<vmem>>, vector<16x128xf32>
      %13 = arith.truncf %12 : vector<16x128xf32> to vector<16x128xbf16>
      %c0_12 = arith.constant 0 : index
      %c0_13 = arith.constant 0 : index
      %14 = vector.load %arg5[%c0_12, %c0_13] : memref<16x128xbf16, #tpu.memory_space<vmem>>, vector<16x128xbf16>
      tpu.vector_store %arg5[%c0_12, %c0_13], %13 {strides = array<i32>} : memref<16x128xbf16, #tpu.memory_space<vmem>>, vector<16x128xbf16>,
      %cst_14 = arith.constant dense<0.000000e+00> : vector<128xf32>
      %15 = vector.multi_reduction <add>, %12, %cst_14 [0] : vector<16x128xf32> to vector<128xf32>
      %16 = vector.shape_cast %15 : vector<128xf32> to vector<1x128xf32>
      %17 = vector.shape_cast %16 : vector<1x128xf32> to vector<1x1x128xf32>
      %c0_15 = arith.constant 0 : index
      %c0_16 = arith.constant 0 : index
      %c0_17 = arith.constant 0 : index
      %18 = vector.load %arg6[%c0_15, %c0_16, %c0_17] : memref<1x1x128xf32, #tpu.memory_space<vmem>>, vector<1x1x128xf32>
      tpu.vector_store %arg6[%c0_15, %c0_16, %c0_17], %17 {strides = array<i32>} : memref<1x1x128xf32, #tpu.memory_space<vmem>>, vector<1x1x128xf32>,
      %19 = arith.mulf %12, %12 : vector<16x128xf32>
      %cst_18 = arith.constant dense<0.000000e+00> : vector<128xf32>
      %20 = vector.multi_reduction <add>, %19, %cst_18 [0] : vector<16x128xf32> to vector<128xf32>
      %21 = vector.shape_cast %20 : vector<128xf32> to vector<1x128xf32>
      %22 = vector.shape_cast %21 : vector<1x128xf32> to vector<1x1x128xf32>
      %c0_19 = arith.constant 0 : index
      %c0_20 = arith.constant 0 : index
      %c0_21 = arith.constant 0 : index
      %23 = vector.load %arg7[%c0_19, %c0_20, %c0_21] : memref<1x1x128xf32, #tpu.memory_space<vmem>>, vector<1x1x128xf32>
      tpu.vector_store %arg7[%c0_19, %c0_20, %c0_21], %22 {strides = array<i32>} : memref<1x1x128xf32, #tpu.memory_space<vmem>>, vector<1x1x128xf32>,
    } else {
    }
    return
  }
  func.func @transform_0(%arg0: i32, %arg1: i32, %arg2: i32) -> (i32, i32) {
    %c0_i32 = arith.constant 0 : i32
    return %arg0, %arg2 : i32, i32
  }
  func.func @transform_1(%arg0: i32, %arg1: i32, %arg2: i32) -> (i32, i32) {
    %c0_i32 = arith.constant 0 : i32
    return %arg2, %arg1 : i32, i32
  }
  func.func @transform_2(%arg0: i32, %arg1: i32, %arg2: i32) -> (i32, i32) {
    %c0_i32 = arith.constant 0 : i32
    return %arg0, %arg1 : i32, i32
  }
  func.func @transform_3(%arg0: i32, %arg1: i32, %arg2: i32) -> (i32, i32, i32) {
    %c0_i32 = arith.constant 0 : i32
    %c0_i32_0 = arith.constant 0 : i32
    return %arg0, %c0_i32, %arg1 : i32, i32, i32
  }
  func.func @transform_4(%arg0: i32, %arg1: i32, %arg2: i32) -> (i32, i32, i32) {
    %c0_i32 = arith.constant 0 : i32
    %c0_i32_0 = arith.constant 0 : i32
    return %arg0, %c0_i32, %arg1 : i32, i32, i32
  }
}

module attributes {stable_mosaic.version = 11 : i64} {
  func.func @_conv_bias_act_kernel(%arg0: i32, %arg1: i32, %arg2: i32, %arg3: memref<16x1024xbf16, #tpu.memory_space<vmem>>, %arg4: memref<1024x128xbf16, #tpu.memory_space<vmem>>, %arg5: memref<1x128xf32, #tpu.memory_space<vmem>>, %arg6: memref<16x128xf32, #tpu.memory_space<vmem>>, %arg7: memref<16x128xf32, #tpu.memory_space<vmem>>) attributes {dimension_semantics = [#tpu.dimension_semantics<parallel>, #tpu.dimension_semantics<parallel>, #tpu.dimension_semantics<arbitrary>], iteration_bounds = array<i64: 1, 1, 1>, scalar_prefetch = 0 : i64, scratch_operands = 1 : i64, tpu.core_type = #tpu.core_type<tc>, window_params = [{transform_indices = @transform_0, window_bounds = array<i64: 16, 1024>}, {transform_indices = @transform_1, window_bounds = array<i64: 1024, 128>}, {transform_indices = @transform_2, window_bounds = array<i64: 1, 128>}, {transform_indices = @transform_3, window_bounds = array<i64: 16, 128>}]} {
    %c0_i32 = arith.constant 0 : i32
    %0 = arith.cmpi eq, %arg2, %c0_i32 : i32
    %1 = arith.extui %0 : i1 to i32
    %c0_i32_0 = arith.constant 0 : i32
    %2 = arith.cmpi ne, %1, %c0_i32_0 : i32
    scf.if %2 {
      %cst_10 = arith.constant 0.000000e+00 : f32
      %12 = vector.broadcast %cst_10 : f32 to vector<16x128xf32>
      %c0_11 = arith.constant 0 : index
      %c0_12 = arith.constant 0 : index
      %13 = vector.load %arg7[%c0_11, %c0_12] : memref<16x128xf32, #tpu.memory_space<vmem>>, vector<16x128xf32>
      tpu.vector_store %arg7[%c0_11, %c0_12], %12 {strides = array<i32>} : memref<16x128xf32, #tpu.memory_space<vmem>>, vector<16x128xf32>,
    } else {
    }
    %c0 = arith.constant 0 : index
    %c0_1 = arith.constant 0 : index
    %3 = vector.load %arg7[%c0, %c0_1] : memref<16x128xf32, #tpu.memory_space<vmem>>, vector<16x128xf32>
    %c0_2 = arith.constant 0 : index
    %c0_3 = arith.constant 0 : index
    %4 = vector.load %arg3[%c0_2, %c0_3] : memref<16x1024xbf16, #tpu.memory_space<vmem>>, vector<16x1024xbf16>
    %c0_4 = arith.constant 0 : index
    %c0_5 = arith.constant 0 : index
    %5 = vector.load %arg4[%c0_4, %c0_5] : memref<1024x128xbf16, #tpu.memory_space<vmem>>, vector<1024x128xbf16>
    %cst = arith.constant dense<0.000000e+00> : vector<16x128xf32>
    %6 = tpu.matmul %4, %5, %cst {dimension_numbers = #tpu.dot_dimension_numbers<[1], [0], [0], [1], [0, 0, 1, 1], [], []>} : vector<16x1024xbf16>, vector<1024x128xbf16>, vector<16x128xf32> -> vector<16x128xf32>
    %7 = arith.addf %3, %6 : vector<16x128xf32>
    %c0_6 = arith.constant 0 : index
    %c0_7 = arith.constant 0 : index
    %8 = vector.load %arg7[%c0_6, %c0_7] : memref<16x128xf32, #tpu.memory_space<vmem>>, vector<16x128xf32>
    tpu.vector_store %arg7[%c0_6, %c0_7], %7 {strides = array<i32>} : memref<16x128xf32, #tpu.memory_space<vmem>>, vector<16x128xf32>,
    %c0_i32_8 = arith.constant 0 : i32
    %9 = arith.cmpi eq, %arg2, %c0_i32_8 : i32
    %10 = arith.extui %9 : i1 to i32
    %c0_i32_9 = arith.constant 0 : i32
    %11 = arith.cmpi ne, %10, %c0_i32_9 : i32
    scf.if %11 {
      %c0_10 = arith.constant 0 : index
      %c0_11 = arith.constant 0 : index
      %12 = vector.load %arg7[%c0_10, %c0_11] : memref<16x128xf32, #tpu.memory_space<vmem>>, vector<16x128xf32>
      %c0_12 = arith.constant 0 : index
      %c0_13 = arith.constant 0 : index
      %13 = vector.load %arg5[%c0_12, %c0_13] : memref<1x128xf32, #tpu.memory_space<vmem>>, vector<1x128xf32>
      %14 = vector.broadcast %13 : vector<1x128xf32> to vector<16x128xf32>
      %15 = arith.addf %12, %14 : vector<16x128xf32>
      %c0_14 = arith.constant 0 : index
      %c0_15 = arith.constant 0 : index
      %16 = vector.load %arg6[%c0_14, %c0_15] : memref<16x128xf32, #tpu.memory_space<vmem>>, vector<16x128xf32>
      tpu.vector_store %arg6[%c0_14, %c0_15], %15 {strides = array<i32>} : memref<16x128xf32, #tpu.memory_space<vmem>>, vector<16x128xf32>,
    } else {
    }
    return
  }
  func.func @transform_0(%arg0: i32, %arg1: i32, %arg2: i32) -> (i32, i32) {
    %c0_i32 = arith.constant 0 : i32
    return %arg0, %arg2 : i32, i32
  }
  func.func @transform_1(%arg0: i32, %arg1: i32, %arg2: i32) -> (i32, i32) {
    %c0_i32 = arith.constant 0 : i32
    return %arg2, %arg1 : i32, i32
  }
  func.func @transform_2(%arg0: i32, %arg1: i32, %arg2: i32) -> (i32, i32) {
    %c0_i32 = arith.constant 0 : i32
    %c0_i32_0 = arith.constant 0 : i32
    return %c0_i32, %arg1 : i32, i32
  }
  func.func @transform_3(%arg0: i32, %arg1: i32, %arg2: i32) -> (i32, i32) {
    %c0_i32 = arith.constant 0 : i32
    return %arg0, %arg1 : i32, i32
  }
}

</mosaic_0001>

<bundles_post_ra>
// kernel: _lambda_.5
= control target key start
LH: loop header
LB: loop body
LE: loop exit
PB: predicated region body
PF: predicated region fallthrough
CT: control target
= control target key end

     0   :  { %s1520_s12 = smov 0   ;;  %s1522_s13 = smov 0   ;;  %s1661_s0 = inlined_call_operand.vmem [shape: bf16[512,64], index: 0, kind: input, shape index: {}]   ;;  %s1662_s1 = inlined_call_operand.vmem [shape: bf16[64,128], index: 1, kind: input, shape index: {}]   ;;  %s1663_s2 = inlined_call_operand.vmem [shape: f32[1,128], index: 2, kind: input, shape index: {}]   ;;  %s1664_s3 = inlined_call_operand.vmem [shape: bf16[512,128], index: 3, kind: output, shape index: {}]  }
   0x1   :  { %s1524_s14 = smov 0  }
   0x2 LB: > { %s32_s15 = sadd.s32 1, %s1494_s13  ;;  %p1161_p0 = scmp.ge.s32.totalorder %s1498_s14, 1  ;;  %s1498_s14 = sphi %s1524_s14, %s13_s14   ;;  %s1494_s13 = sphi %s1522_s13, %s1666_s13   ;;  %s1490_s12 = sphi %s1520_s12, %s1665_s12  }
   0x3   : > { %p34_p1 = scmp.ge.s32.totalorder %s32_s15, 2  ;;  %p188_p2 = scmp.lt.s32.totalorder %s1498_s14, 3 }
   0x5   : > { %s1668_s15 = smov (%p34_p1, %s32_s15), 0  ;;  %p189_p3 = pnand %p1161_p0, %p188_p2 }
   0x6   : > { %s1162_s18 = sshll.u32 (!%p189_p3), %s1490_s12, 5 }
   0x7   : > { %192 = sbr.rel (%p189_p3) target bundleno = 261 (0x105), region = 32  ;;  %p230_p4 = scmp.lt.s32.totalorder (!%p189_p3), %s1162_s18, 63 }
   0xc   : > { %v1456_v0 = vld [vmem:[%s1662_s1 + $0x18] sm:$0xff]   ;;  %v1457_v1 = vld [vmem:[%s1662_s1 + $0x10] sm:$0xff]   ;;  %s1670_s18 = smov (!%p230_p4, %s1162_s18), 63  ;;  %v1458_v2 = vld [vmem:[%s1662_s1 + $0x8] sm:$0xff]   ;;  %vm472_vm0 = vcmask 523264  }
   0xd   : > { %1384 = vmatprep.subr.bf16.mxu0 %v1456_v0  ;;  %1424 = vmatprep.subr.bf16.mxu1 %v1456_v0  ;;  %s1163_s23 = sshll.u32 %s1670_s18, 2  ;;  %v1459_v3 = vld [vmem:[%s1662_s1] sm:$0xff]  }
   0xe   : > { %1385 = vmatpush3.bf16.msra.mxu0 %v1456_v0  ;;  %1428 = vmatpush3.bf16.msra.mxu1 %v1456_v0  ;;  %s1558_s28 = scalar_lea.vmem %s1661_s0, %s1163_s23  ;;  %v1595_v20 = vld [vmem:[%s1663_s2] ss:$0 sm:$0xff]  ;;  %s1612_s6 = scalar_lea.vmem %s1664_s3, %s1163_s23 }
   0xf   : > { %1386 = vmatprep.subr.bf16.mxu0 %v1457_v1  ;;  %1425 = vmatprep.subr.bf16.mxu1 %v1457_v1  ;;  %v1460_v4 = vld [vmem:[%s1558_s28] sm:$0xff]   ;;  %v1462_v6 = vld [vmem:[%s1558_s28 + $0x8] sm:$0xff]   ;;  %v1464_v8 = vld [vmem:[%s1558_s28 + $0x10] sm:$0xff]  }
  0x10   : > { %v1461_v5 = vld [vmem:[%s1558_s28 + $0x40] sm:$0xff]   ;;  %1392 = vmatprep.mubr.msk.bf16.mxu0 %vm472_vm0, %v1460_v4  ;;  %v1463_v7 = vld [vmem:[%s1558_s28 + $0x48] sm:$0xff]   ;;  %v1465_v9 = vld [vmem:[%s1558_s28 + $0x50] sm:$0xff]  }
  0x11   : > { %1408 = vmatprep.mubr.msk.bf16.mxu1 %vm472_vm0, %v1461_v5  ;;  %v1466_v10 = vld [vmem:[%s1558_s28 + $0x18] sm:$0xff]   ;;  %v1468_v12 = vld [vmem:[%s1558_s28 + $0x20] sm:$0xff]   ;;  %v1470_v14 = vld [vmem:[%s1558_s28 + $0x28] sm:$0xff]  }
  0x12   : > { %1387 = vmatpush3.bf16.msra.mxu0 %v1457_v1  ;;  %1429 = vmatpush3.bf16.msra.mxu1 %v1457_v1  ;;  %v1467_v11 = vld [vmem:[%s1558_s28 + $0x58] sm:$0xff]   ;;  %v1469_v13 = vld [vmem:[%s1558_s28 + $0x60] sm:$0xff]   ;;  %v1471_v15 = vld [vmem:[%s1558_s28 + $0x68] sm:$0xff]  }
  0x13   : > { %1388 = vmatprep.subr.bf16.mxu0 %v1458_v2  ;;  %1426 = vmatprep.subr.bf16.mxu1 %v1458_v2  ;;  %v1472_v16 = vld [vmem:[%s1558_s28 + $0x30] sm:$0xff]   ;;  %v1474_v18 = vld [vmem:[%s1558_s28 + $0x38] sm:$0xff]  }
  0x14   : > { %v1473_v17 = vld [vmem:[%s1558_s28 + $0x70] sm:$0xff]   ;;  %v1475_v19 = vld [vmem:[%s1558_s28 + $0x78] sm:$0xff]  }
  0x16   : > { %1389 = vmatpush3.bf16.msra.mxu0 %v1458_v2  ;;  %1430 = vmatpush3.bf16.msra.mxu1 %v1458_v2 }
  0x17   : > { %1390 = vmatprep.subr.bf16.mxu0 %v1459_v3  ;;  %1427 = vmatprep.subr.bf16.mxu1 %v1459_v3 }
  0x1a   : > { %1391 = vmatpush3.bf16.msra.mxu0 %v1459_v3  ;;  %1431 = vmatpush3.bf16.msra.mxu1 %v1459_v3 }
  0x1d   : > { %1393 = vmatmul.mubr.msk.bf16.vlgmr.msra.gmra.mxu0 %vm472_vm0, %v1462_v6  ;;  %1409 = vmatmul.mubr.msk.bf16.vlgmr.msra.gmra.mxu1 %vm472_vm0, %v1463_v7 }
  0x1e   : > { %1396 = vmatprep.mubr.msk.bf16.mxu0 %vm472_vm0, %v1464_v8  ;;  %1412 = vmatprep.mubr.msk.bf16.mxu1 %vm472_vm0, %v1465_v9 }
  0x25   : > { %1397 = vmatmul.mubr.msk.bf16.gmra.mxu0 %vm472_vm0, %v1466_v10  ;;  %1413 = vmatmul.mubr.msk.bf16.gmra.mxu1 %vm472_vm0, %v1467_v11 }
  0x26   : > { %1400 = vmatprep.mubr.msk.bf16.mxu0 %vm472_vm0, %v1468_v12  ;;  %1416 = vmatprep.mubr.msk.bf16.mxu1 %vm472_vm0, %v1469_v13 }
  0x2d   : > { %1401 = vmatmul.mubr.msk.bf16.gmra.mxu0 %vm472_vm0, %v1470_v14  ;;  %1417 = vmatmul.mubr.msk.bf16.gmra.mxu1 %vm472_vm0, %v1471_v15 }
  0x2e   : > { %1404 = vmatprep.mubr.msk.bf16.mxu0 %vm472_vm0, %v1472_v16  ;;  %1420 = vmatprep.mubr.msk.bf16.mxu1 %vm472_vm0, %v1473_v17 }
  0x35   : > { %1405 = vmatmul.mubr.msk.bf16.gmra.mxu0 %vm472_vm0, %v1474_v18  ;;  %1421 = vmatmul.mubr.msk.bf16.gmra.mxu1 %vm472_vm0, %v1475_v19 }
  0xdd   : > { %v1394_v21 = vpop.f32.mrf.mxu0  ;;  %v1410_v22 = vpop.f32.mrf.mxu1 }
  0xde   : > { %v790_v23 = vadd.f32 %v1394_v21, %v1595_v20  ;;  %v806_v24 = vadd.f32 %v1410_v22, %v1595_v20 }
  0xdf   : > { %v555_v25 = vpop.f32.mrf.mxu0  ;;  %v619_v26 = vpop.f32.mrf.mxu1 }
  0xe0   : > { %v788_v27 = vadd.f32 %v1595_v20, %v555_v25  ;;  %v804_v28 = vadd.f32 %v1595_v20, %v619_v26  ;;  %v822_v31 = vmul.f32 0.2, %v790_v23  ;;  %v838_v32 = vmul.f32 0.2, %v806_v24 }
  0xe1   : > { %v1395_v29 = vpop.f32.mrf.mxu0  ;;  %v1411_v30 = vpop.f32.mrf.mxu1 }
  0xe2   : > { %v791_v33 = vadd.f32 %v1395_v29, %v1595_v20  ;;  %v807_v34 = vadd.f32 %v1411_v30, %v1595_v20  ;;  %v820_v37 = vmul.f32 0.2, %v788_v27  ;;  %v836_v38 = vmul.f32 0.2, %v804_v28 }
  0xe3   : > { %v558_v35 = vpop.f32.mrf.mxu0  ;;  %v622_v36 = vpop.f32.mrf.mxu1  ;;  %v854_v45 = vmax.f32 %v790_v23, %v822_v31  ;;  %v870_v46 = vmax.f32 %v806_v24, %v838_v32 }
  0xe4   : > { %v789_v39 = vadd.f32 %v1595_v20, %v558_v35  ;;  %v805_v40 = vadd.f32 %v1595_v20, %v622_v36  ;;  %v823_v41 = vmul.f32 0.2, %v791_v33  ;;  %v839_v42 = vmul.f32 0.2, %v807_v34 }
  0xe5   : > { %v1398_v43 = vpop.f32.mrf.mxu0  ;;  %v1414_v44 = vpop.f32.mrf.mxu1  ;;  %v852_v55 = vmax.f32 %v788_v27, %v820_v37  ;;  %v868_v56 = vmax.f32 %v804_v28, %v836_v38 }
  0xe6   : > { %v821_v47 = vmul.f32 0.2, %v789_v39  ;;  %v837_v48 = vmul.f32 0.2, %v805_v40  ;;  %v855_v49 = vmax.f32 %v791_v33, %v823_v41  ;;  %v871_v50 = vmax.f32 %v807_v34, %v839_v42 }
  0xe7   : > { %v794_v51 = vadd.f32 %v1398_v43, %v1595_v20  ;;  %v810_v52 = vadd.f32 %v1414_v44, %v1595_v20  ;;  %v571_v53 = vpop.f32.mrf.mxu0  ;;  %v635_v54 = vpop.f32.mrf.mxu1 }
  0xe8   : > { %v853_v57 = vmax.f32 %v789_v39, %v821_v47  ;;  %v869_v58 = vmax.f32 %v805_v40, %v837_v48  ;;  %v1277_v59 = vpack.c.bf16 %v855_v49, %v854_v45  ;;  %v1317_v60 = vpack.c.bf16 %v871_v50, %v870_v46 }
  0xe9   : > { %v792_v61 = vadd.f32 %v1595_v20, %v571_v53  ;;  %v808_v62 = vadd.f32 %v1595_v20, %v635_v54  ;;  %v1399_v63 = vpop.f32.mrf.mxu0  ;;  %v1415_v0 = vpop.f32.mrf.mxu1  ;;  %v826_v3 = vmul.f32 0.2, %v794_v51  ;;  %v842_v4 = vmul.f32 0.2, %v810_v52 }
  0xea   : > { %v1272_v1 = vpack.c.bf16 %v853_v57, %v852_v55  ;;  %v1312_v2 = vpack.c.bf16 %v869_v58, %v868_v56  ;;  %1349 = vst [vmem:[%s1612_s6 + $0x8] sm:$0xff] %v1277_v59   ;;  %1357 = vst [vmem:[%s1612_s6 + $0x48] sm:$0xff] %v1317_v60   ;;  %v795_v5 = vadd.f32 %v1399_v63, %v1595_v20 }
  0xeb   : > { %v811_v6 = vadd.f32 %v1415_v0, %v1595_v20  ;;  %v574_v7 = vpop.f32.mrf.mxu0  ;;  %v638_v8 = vpop.f32.mrf.mxu1  ;;  %v824_v9 = vmul.f32 0.2, %v792_v61  ;;  %v840_v10 = vmul.f32 0.2, %v808_v62  ;;  %v858_v22 = vmax.f32 %v794_v51, %v826_v3 }
  0xec   : > { %1273 = vst [vmem:[%s1612_s6] sm:$0xff] %v1272_v1   ;;  %1356 = vst [vmem:[%s1612_s6 + $0x40] sm:$0xff] %v1312_v2   ;;  %v793_v11 = vadd.f32 %v1595_v20, %v574_v7  ;;  %v809_v12 = vadd.f32 %v1595_v20, %v638_v8  ;;  %v827_v13 = vmul.f32 0.2, %v795_v5  ;;  %v874_v23 = vmax.f32 %v810_v52, %v842_v4 }
  0xed   : > { %v843_v14 = vmul.f32 0.2, %v811_v6  ;;  %v1402_v15 = vpop.f32.mrf.mxu0  ;;  %v1418_v16 = vpop.f32.mrf.mxu1  ;;  %v856_v28 = vmax.f32 %v792_v61, %v824_v9  ;;  %v872_v29 = vmax.f32 %v808_v62, %v840_v10 }
  0xee   : > { %v825_v17 = vmul.f32 0.2, %v793_v11  ;;  %v841_v18 = vmul.f32 0.2, %v809_v12  ;;  %v798_v19 = vadd.f32 %v1402_v15, %v1595_v20  ;;  %v814_v21 = vadd.f32 %v1418_v16, %v1595_v20 }
  0xef   : > { %v859_v24 = vmax.f32 %v795_v5, %v827_v13  ;;  %v875_v25 = vmax.f32 %v811_v6, %v843_v14  ;;  %v587_v26 = vpop.f32.mrf.mxu0  ;;  %v651_v27 = vpop.f32.mrf.mxu1 }
  0xf0   : > { %v857_v30 = vmax.f32 %v793_v11, %v825_v17  ;;  %v873_v31 = vmax.f32 %v809_v12, %v841_v18  ;;  %v796_v34 = vadd.f32 %v1595_v20, %v587_v26  ;;  %v812_v35 = vadd.f32 %v1595_v20, %v651_v27 }
  0xf1   : > { %v1287_v32 = vpack.c.bf16 %v859_v24, %v858_v22  ;;  %v1327_v33 = vpack.c.bf16 %v875_v25, %v874_v23  ;;  %v1403_v36 = vpop.f32.mrf.mxu0  ;;  %v1419_v37 = vpop.f32.mrf.mxu1  ;;  %v830_v40 = vmul.f32 0.2, %v798_v19  ;;  %v846_v41 = vmul.f32 0.2, %v814_v21 }
  0xf2   : > { %v1282_v38 = vpack.c.bf16 %v857_v30, %v856_v28  ;;  %v1322_v39 = vpack.c.bf16 %v873_v31, %v872_v29  ;;  %v799_v42 = vadd.f32 %v1403_v36, %v1595_v20  ;;  %v815_v43 = vadd.f32 %v1419_v37, %v1595_v20 }
  0xf3   : > { %1351 = vst [vmem:[%s1612_s6 + $0x18] sm:$0xff] %v1287_v32   ;;  %1359 = vst [vmem:[%s1612_s6 + $0x58] sm:$0xff] %v1327_v33   ;;  %v590_v44 = vpop.f32.mrf.mxu0  ;;  %v654_v45 = vpop.f32.mrf.mxu1  ;;  %v828_v46 = vmul.f32 0.2, %v796_v34  ;;  %v844_v47 = vmul.f32 0.2, %v812_v35  ;;  %v862_v54 = vmax.f32 %v798_v19, %v830_v40  ;;  %v878_v55 = vmax.f32 %v814_v21, %v846_v41 }
  0xf4   : > { %1350 = vst [vmem:[%s1612_s6 + $0x10] sm:$0xff] %v1282_v38   ;;  %1358 = vst [vmem:[%s1612_s6 + $0x50] sm:$0xff] %v1322_v39   ;;  %v797_v48 = vadd.f32 %v1595_v20, %v590_v44  ;;  %v813_v49 = vadd.f32 %v1595_v20, %v654_v45  ;;  %v831_v50 = vmul.f32 0.2, %v799_v42  ;;  %v847_v51 = vmul.f32 0.2, %v815_v43 }
  0xf5   : > { %v1406_v52 = vpop.f32.mrf.mxu0  ;;  %v1422_v53 = vpop.f32.mrf.mxu1  ;;  %v860_v0 = vmax.f32 %v796_v34, %v828_v46  ;;  %v876_v1 = vmax.f32 %v812_v35, %v844_v47 }
  0xf6   : > { %v829_v56 = vmul.f32 0.2, %v797_v48  ;;  %v845_v57 = vmul.f32 0.2, %v813_v49  ;;  %v863_v58 = vmax.f32 %v799_v42, %v831_v50  ;;  %v879_v59 = vmax.f32 %v815_v43, %v847_v51 }
  0xf7   : > { %v802_v60 = vadd.f32 %v1406_v52, %v1595_v20  ;;  %v818_v61 = vadd.f32 %v1422_v53, %v1595_v20  ;;  %v603_v62 = vpop.f32.mrf.mxu0  ;;  %v667_v63 = vpop.f32.mrf.mxu1 }
  0xf8   : > { %v861_v2 = vmax.f32 %v797_v48, %v829_v56  ;;  %v877_v3 = vmax.f32 %v813_v49, %v845_v57  ;;  %v1297_v4 = vpack.c.bf16 %v863_v58, %v862_v54  ;;  %v1337_v5 = vpack.c.bf16 %v879_v59, %v878_v55 }
  0xf9   : > { %v800_v6 = vadd.f32 %v1595_v20, %v603_v62  ;;  %v816_v7 = vadd.f32 %v1595_v20, %v667_v63  ;;  %v1407_v8 = vpop.f32.mrf.mxu0  ;;  %v1423_v9 = vpop.f32.mrf.mxu1  ;;  %v834_v12 = vmul.f32 0.2, %v802_v60  ;;  %v850_v13 = vmul.f32 0.2, %v818_v61 }
  0xfa   : > { %v1292_v10 = vpack.c.bf16 %v861_v2, %v860_v0  ;;  %v1332_v11 = vpack.c.bf16 %v877_v3, %v876_v1  ;;  %1353 = vst [vmem:[%s1612_s6 + $0x28] sm:$0xff] %v1297_v4   ;;  %1361 = vst [vmem:[%s1612_s6 + $0x68] sm:$0xff] %v1337_v5   ;;  %v803_v14 = vadd.f32 %v1407_v8, %v1595_v20 }
  0xfb   : > { %v819_v15 = vadd.f32 %v1423_v9, %v1595_v20  ;;  %v606_v16 = vpop.f32.mrf.mxu0  ;;  %v670_v17 = vpop.f32.mrf.mxu1  ;;  %v832_v18 = vmul.f32 0.2, %v800_v6  ;;  %v848_v19 = vmul.f32 0.2, %v816_v7  ;;  %v866_v27 = vmax.f32 %v802_v60, %v834_v12 }
  0xfc   : > { %1352 = vst [vmem:[%s1612_s6 + $0x20] sm:$0xff] %v1292_v10   ;;  %1360 = vst [vmem:[%s1612_s6 + $0x60] sm:$0xff] %v1332_v11   ;;  %v801_v21 = vadd.f32 %v1595_v20, %v606_v16  ;;  %v817_v22 = vadd.f32 %v1595_v20, %v670_v17  ;;  %v835_v23 = vmul.f32 0.2, %v803_v14  ;;  %v882_v28 = vmax.f32 %v818_v61, %v850_v13 }
  0xfd   : > { %v851_v24 = vmul.f32 0.2, %v819_v15  ;;  %v864_v31 = vmax.f32 %v800_v6, %v832_v18  ;;  %v880_v32 = vmax.f32 %v816_v7, %v848_v19 }
  0xfe   : > { %v833_v25 = vmul.f32 0.2, %v801_v21  ;;  %v849_v26 = vmul.f32 0.2, %v817_v22  ;;  %v867_v29 = vmax.f32 %v803_v14, %v835_v23 }
  0xff   : > { %v883_v30 = vmax.f32 %v819_v15, %v851_v24 }
 0x100   : > { %v865_v33 = vmax.f32 %v801_v21, %v833_v25  ;;  %v881_v34 = vmax.f32 %v817_v22, %v849_v26  ;;  %v1307_v35 = vpack.c.bf16 %v867_v29, %v866_v27 }
 0x101   : > { %v1347_v36 = vpack.c.bf16 %v883_v30, %v882_v28 }
 0x102   : > { %v1302_v37 = vpack.c.bf16 %v865_v33, %v864_v31  ;;  %v1342_v20 = vpack.c.bf16 %v881_v34, %v880_v32  ;;  %1355 = vst [vmem:[%s1612_s6 + $0x38] sm:$0xff] %v1307_v35  }
 0x103   : > { %1363 = vst [vmem:[%s1612_s6 + $0x78] sm:$0xff] %v1347_v36  }
 0x104   : > { %1354 = vst [vmem:[%s1612_s6 + $0x30] sm:$0xff] %v1302_v37   ;;  %1362 = vst [vmem:[%s1612_s6 + $0x70] sm:$0xff] %v1342_v20  }
 0x105 PF: > { %s13_s14 = sadd.s32 1, %s1498_s14   ;;  %s1665_s12 = smov %s1494_s13 }
 0x106   : > { %p10_p5 = scmp.ge.s32.totalorder %s13_s14, 4   ;;  %s1666_s13 = smov %s1668_s15 }
 0x108   :  { %12 = sbr.rel (!%p10_p5) target bundleno = 2 (0x2), region = 76 }

// kernel: _lambda_.6
= control target key start
LH: loop header
LB: loop body
LE: loop exit
PB: predicated region body
PF: predicated region fallthrough
CT: control target
= control target key end

     0   :  { %s959_s15 = smov 0   ;;  %s961_s16 = smov 0   ;;  %s1040_s0 = inlined_call_operand.vmem [shape: bf16[128,128], index: 0, kind: input, shape index: {}]   ;;  %s1041_s1 = inlined_call_operand.vmem [shape: bf16[128,128], index: 1, kind: input, shape index: {}]   ;;  %s1042_s2 = inlined_call_operand.vmem [shape: bf16[128,128], index: 2, kind: output, shape index: {0}]   ;;  %s1043_s3 = inlined_call_operand.vmem [shape: f32[2,1,128], index: 3, kind: output, shape index: {1}]   ;;  %s1044_s4 = inlined_call_operand.vmem [shape: f32[2,1,128], index: 4, kind: output, shape index: {2}]  }
   0x1   :  { %s963_s17 = smov 0  }
   0x2 LB: > { %s34_s18 = sadd.s32 1, %s928_s16  ;;  %p764_p0 = scmp.ge.s32.totalorder %s932_s17, 1  ;;  %s932_s17 = sphi %s963_s17, %s15_s17   ;;  %s928_s16 = sphi %s961_s16, %s1046_s16   ;;  %s924_s15 = sphi %s959_s15, %s1045_s15  }
   0x3   : > { %p36_p1 = scmp.ge.s32.totalorder %s34_s18, 2  ;;  %p214_p2 = scmp.lt.s32.totalorder %s932_s17, 3 }
   0x5   : > { %s1048_s18 = smov (%p36_p1, %s34_s18), 0  ;;  %p215_p3 = pnand %p764_p0, %p214_p2 }
   0x6   : > { %s765_s21 = sshll.u32 (!%p215_p3), %s924_s15, 3  ;;  %p293_p5 = scmp.lt.s32.totalorder (!%p215_p3), %s924_s15, 1 }
   0x7   : > { %218 = sbr.rel (%p215_p3) target bundleno = 273 (0x111), region = 28  ;;  %p267_p4 = scmp.lt.s32.totalorder (!%p215_p3), %s765_s21, 15 }
   0xc   : > { %v898_v0 = vld [vmem:[%s1041_s1 + $0x38] sm:$0xff]   ;;  %v899_v1 = vld [vmem:[%s1041_s1 + $0x30] sm:$0xff]   ;;  %s1050_s21 = smov (!%p267_p4, %s765_s21), 15  ;;  %v900_v2 = vld [vmem:[%s1041_s1 + $0x28] sm:$0xff]   ;;  %s1052_s15 = smov (!%p293_p5, %s924_s15), 1 }
   0xd   : > { %834 = vmatprep.subr.bf16.mxu0 %v898_v0  ;;  %858 = vmatprep.subr.bf16.mxu1 %v898_v0  ;;  %s766_s26 = sshll.u32 %s1050_s21, 2  ;;  %v901_v3 = vld [vmem:[%s1041_s1 + $0x20] sm:$0xff]   ;;  %v902_v6 = vld [vmem:[%s1041_s1 + $0x18] sm:$0xff]   ;;  %v903_v7 = vld [vmem:[%s1041_s1 + $0x10] sm:$0xff]   ;;  %s298_s23 = scalar_lea.vmem %s1043_s3, %s1052_s15 }
   0xe   : > { %835 = vmatpush3.bf16.msra.mxu0 %v898_v0  ;;  %866 = vmatpush3.bf16.msra.mxu1 %v898_v0  ;;  %s997_s29 = scalar_lea.vmem %s1040_s0, %s766_s26  ;;  %v904_v8 = vld [vmem:[%s1041_s1 + $0x8] sm:$0xff]   ;;  %v905_v9 = vld [vmem:[%s1041_s1] sm:$0xff]   ;;  %s291_s20 = scalar_lea.vmem %s1042_s2, %s766_s26 }
   0xf   : > { %836 = vmatprep.subr.bf16.mxu0 %v899_v1  ;;  %859 = vmatprep.subr.bf16.mxu1 %v899_v1  ;;  %v906_v4 = vld [vmem:[%s997_s29] sm:$0xff]   ;;  %v908_v5 = vld [vmem:[%s997_s29 + $0x10] sm:$0xff]   ;;  %v907_v10 = vld [vmem:[%s997_s29 + $0x8] sm:$0xff]   ;;  %s304_s26 = scalar_lea.vmem %s1044_s4, %s1052_s15 }
  0x10   : > { %850 = vmatprep.mubr.bf16.mxu0 %v906_v4  ;;  %854 = vmatprep.mubr.bf16.mxu1 %v908_v5  ;;  %v909_v11 = vld [vmem:[%s997_s29 + $0x18] sm:$0xff]  }
  0x12   : > { %837 = vmatpush3.bf16.msra.mxu0 %v899_v1  ;;  %867 = vmatpush3.bf16.msra.mxu1 %v899_v1 }
  0x13   : > { %838 = vmatprep.subr.bf16.mxu0 %v900_v2  ;;  %860 = vmatprep.subr.bf16.mxu1 %v900_v2 }
  0x16   : > { %839 = vmatpush3.bf16.msra.mxu0 %v900_v2  ;;  %868 = vmatpush3.bf16.msra.mxu1 %v900_v2 }
  0x17   : > { %840 = vmatprep.subr.bf16.mxu0 %v901_v3  ;;  %861 = vmatprep.subr.bf16.mxu1 %v901_v3 }
  0x1a   : > { %841 = vmatpush3.bf16.msra.mxu0 %v901_v3  ;;  %869 = vmatpush3.bf16.msra.mxu1 %v901_v3 }
  0x1b   : > { %842 = vmatprep.subr.bf16.mxu0 %v902_v6  ;;  %862 = vmatprep.subr.bf16.mxu1 %v902_v6 }
  0x1e   : > { %843 = vmatpush3.bf16.msra.mxu0 %v902_v6  ;;  %870 = vmatpush3.bf16.msra.mxu1 %v902_v6 }
  0x1f   : > { %844 = vmatprep.subr.bf16.mxu0 %v903_v7  ;;  %863 = vmatprep.subr.bf16.mxu1 %v903_v7 }
  0x22   : > { %845 = vmatpush3.bf16.msra.mxu0 %v903_v7  ;;  %871 = vmatpush3.bf16.msra.mxu1 %v903_v7 }
  0x23   : > { %846 = vmatprep.subr.bf16.mxu0 %v904_v8  ;;  %864 = vmatprep.subr.bf16.mxu1 %v904_v8 }
  0x26   : > { %847 = vmatpush3.bf16.msra.mxu0 %v904_v8  ;;  %872 = vmatpush3.bf16.msra.mxu1 %v904_v8 }
  0x27   : > { %848 = vmatprep.subr.bf16.mxu0 %v905_v9  ;;  %865 = vmatprep.subr.bf16.mxu1 %v905_v9 }
  0x2a   : > { %849 = vmatpush3.bf16.msra.mxu0 %v905_v9  ;;  %873 = vmatpush3.bf16.msra.mxu1 %v905_v9 }
  0x2d   : > { %851 = vmatmul.mubr.bf16.vlgmr.msra.gmra.mxu0 %v907_v10  ;;  %855 = vmatmul.mubr.bf16.vlgmr.msra.gmra.mxu1 %v909_v11 }
  0xed   : > { %v852_v12 = vpop.f32.mrf.mxu0  ;;  %v856_v13 = vpop.f32.mrf.mxu1 }
  0xee   : > { %v570_v27 = vmul.f32 %v852_v12, %v852_v12  ;;  %v574_v39 = vmul.f32 %v856_v13, %v856_v13 }
  0xef   : > { %v456_v14 = vpop.f32.mrf.mxu0  ;;  %v472_v15 = vpop.f32.mrf.mxu1 }
  0xf0   : > { %v568_v20 = vmul.f32 %v456_v14, %v456_v14  ;;  %v572_v33 = vmul.f32 %v472_v15, %v472_v15 }
  0xf1   : > { %v853_v16 = vpop.f32.mrf.mxu0  ;;  %v857_v17 = vpop.f32.mrf.mxu1 }
  0xf2   : > { %v807_v18 = vpack.c.bf16 %v853_v16, %v852_v12  ;;  %v817_v19 = vpack.c.bf16 %v857_v17, %v856_v13  ;;  %v571_v30 = vmul.f32 %v853_v16, %v853_v16  ;;  %v575_v42 = vmul.f32 %v857_v17, %v857_v17 }
  0xf3   : > { %v459_v21 = vpop.f32.mrf.mxu0  ;;  %v475_v22 = vpop.f32.mrf.mxu1 }
  0xf4   : > { %819 = vst [vmem:[%s291_s20 + $0x8] sm:$0xff] %v807_v18   ;;  %v802_v23 = vpack.c.bf16 %v459_v21, %v456_v14  ;;  %v554_v24 = vadd.f32 %v459_v21, %v456_v14  ;;  %v569_v25 = vmul.f32 %v459_v21, %v459_v21  ;;  %821 = vst [vmem:[%s291_s20 + $0x18] sm:$0xff] %v817_v19  }
  0xf5   : > { %v812_v26 = vpack.c.bf16 %v475_v22, %v472_v15  ;;  %v573_v37 = vmul.f32 %v475_v22, %v475_v22 }
  0xf6   : > { %803 = vst [vmem:[%s291_s20] sm:$0xff] %v802_v23   ;;  %v555_v28 = vadd.f32 %v852_v12, %v554_v24  ;;  %v576_v29 = vadd.f32 %v569_v25, %v568_v20 }
  0xf7   : > { %820 = vst [vmem:[%s291_s20 + $0x10] sm:$0xff] %v812_v26  }
  0xf8   : > { %v577_v31 = vadd.f32 %v576_v29, %v570_v27  ;;  %v556_v32 = vadd.f32 %v853_v16, %v555_v28 }
  0xfa   : > { %v557_v34 = vadd.f32 %v556_v32, %v472_v15  ;;  %v578_v35 = vadd.f32 %v577_v31, %v571_v30 }
  0xfc   : > { %v558_v36 = vadd.f32 %v557_v34, %v475_v22  ;;  %v579_v38 = vadd.f32 %v578_v35, %v572_v33 }
  0xfe   : > { %v559_v40 = vadd.f32 %v856_v13, %v558_v36  ;;  %v580_v41 = vadd.f32 %v579_v38, %v573_v37 }
 0x100   : > { %v560_v43 = vadd.f32 %v857_v17, %v559_v40  ;;  %v581_v44 = vadd.f32 %v580_v41, %v574_v39 }
 0x102   : > { %v561_v45 = vrot.slane %v560_v43, 4  ;;  %v582_v46 = vadd.f32 %v581_v44, %v575_v42 }
 0x104   : > { %v562_v47 = vadd.f32 %v561_v45, %v560_v43  ;;  %v583_v48 = vrot.slane %v582_v46, 4 }
 0x106   : > { %v563_v49 = vrot.slane %v562_v47, 2  ;;  %v584_v50 = vadd.f32 %v583_v48, %v582_v46 }
 0x108   : > { %v564_v51 = vadd.f32 %v563_v49, %v562_v47  ;;  %v585_v52 = vrot.slane %v584_v50, 2 }
 0x10a   : > { %v565_v53 = vrot.slane %v564_v51, 1  ;;  %v586_v54 = vadd.f32 %v585_v52, %v584_v50 }
 0x10c   : > { %v566_v55 = vadd.f32 %v565_v53, %v564_v51  ;;  %v587_v56 = vrot.slane %v586_v54, 1 }
 0x10e   : > { %567 = vst [vmem:[%s298_s23] sm:$0x1] %v566_v55  ;;  %v588_v57 = vadd.f32 %v587_v56, %v586_v54 }
 0x110   : > { %589 = vst [vmem:[%s304_s26] sm:$0x1] %v588_v57 }
 0x111 PF: > { %s15_s17 = sadd.s32 1, %s932_s17   ;;  %s1045_s15 = smov %s928_s16 }
 0x112   : > { %p12_p6 = scmp.ge.s32.totalorder %s15_s17, 4   ;;  %s1046_s16 = smov %s1048_s18 }
 0x114   :  { %14 = sbr.rel (!%p12_p6) target bundleno = 2 (0x2), region = 93 }

// kernel: _lambda_.7
= control target key start
LH: loop header
LB: loop body
LE: loop exit
PB: predicated region body
PF: predicated region fallthrough
CT: control target
= control target key end

     0   :  { %s867_s15 = smov 0   ;;  %s869_s16 = smov 0   ;;  %s963_s0 = inlined_call_operand.vmem [shape: bf16[32,256], index: 0, kind: input, shape index: {}]   ;;  %s964_s1 = inlined_call_operand.vmem [shape: bf16[256,128], index: 1, kind: input, shape index: {}]   ;;  %s965_s2 = inlined_call_operand.vmem [shape: bf16[32,128], index: 2, kind: output, shape index: {0}]   ;;  %s966_s3 = inlined_call_operand.vmem [shape: f32[2,1,128], index: 3, kind: output, shape index: {1}]   ;;  %s967_s4 = inlined_call_operand.vmem [shape: f32[2,1,128], index: 4, kind: output, shape index: {2}]  }
   0x1   :  { %s871_s17 = smov 0  }
   0x2 LB: > { %s34_s18 = sadd.s32 1, %s836_s16  ;;  %p717_p0 = scmp.ge.s32.totalorder %s840_s17, 1  ;;  %s840_s17 = sphi %s871_s17, %s15_s17   ;;  %s836_s16 = sphi %s869_s16, %s969_s16   ;;  %s832_s15 = sphi %s867_s15, %s968_s15  }
   0x3   : > { %p36_p1 = scmp.ge.s32.totalorder %s34_s18, 2  ;;  %p217_p2 = scmp.lt.s32.totalorder %s840_s17, 3 }
   0x5   : > { %s971_s18 = smov (%p36_p1, %s34_s18), 0  ;;  %p218_p3 = pnand %p717_p0, %p217_p2 }
   0x6   : > { %s718_s21 = sshll.u32 (!%p218_p3), %s832_s15, 1  ;;  %p301_p5 = scmp.lt.s32.totalorder (!%p218_p3), %s832_s15, 1 }
   0x7   : > { %221 = sbr.rel (%p218_p3) target bundleno = 263 (0x107), region = 28  ;;  %p273_p4 = scmp.lt.s32.totalorder (!%p218_p3), %s718_s21, 3 }
   0xc   : > { %v799_v0 = vld [vmem:[%s964_s1 + $0x78] sm:$0xff]   ;;  %v801_v2 = vld [vmem:[%s964_s1 + $0x70] sm:$0xff]   ;;  %v803_v4 = vld [vmem:[%s964_s1 + $0x68] sm:$0xff]   ;;  %s973_s21 = smov (!%p273_p4, %s718_s21), 3  ;;  %s975_s15 = smov (!%p301_p5, %s832_s15), 1 }
   0xd   : > { %v800_v1 = vld [vmem:[%s964_s1 + $0x38] sm:$0xff]   ;;  %753 = vmatprep.subr.bf16.mxu0 %v799_v0  ;;  %v802_v3 = vld [vmem:[%s964_s1 + $0x30] sm:$0xff]   ;;  %v804_v5 = vld [vmem:[%s964_s1 + $0x28] sm:$0xff]   ;;  %s745_s10 = sshll.u32 %s973_s21, 3  ;;  %s722_s9 = sshll.u32 %s973_s21, 2 }
   0xe   : > { %754 = vmatpush3.bf16.msra.mxu0 %v800_v1  ;;  %v805_v6 = vld [vmem:[%s964_s1 + $0x60] sm:$0xff]   ;;  %v807_v8 = vld [vmem:[%s964_s1 + $0x58] sm:$0xff]   ;;  %s280_s19 = scalar_lea.vmem %s963_s0, %s745_s10  ;;  %v809_v10 = vld [vmem:[%s964_s1 + $0x50] sm:$0xff]   ;;  %s299_s12 = scalar_lea.vmem %s965_s2, %s722_s9 }
   0xf   : > { %755 = vmatprep.subr.bf16.mxu0 %v801_v2  ;;  %v806_v7 = vld [vmem:[%s964_s1 + $0x20] sm:$0xff]   ;;  %v808_v9 = vld [vmem:[%s964_s1 + $0x18] sm:$0xff]   ;;  %v810_v12 = vld [vmem:[%s964_s1 + $0x10] sm:$0xff]   ;;  %s306_s14 = scalar_lea.vmem %s966_s3, %s975_s15  ;;  %s312_s22 = scalar_lea.vmem %s967_s4, %s975_s15 }
  0x10   : > { %v817_v11 = vld [vmem:[%s280_s19 + $0x4] ss:$8 sps:$4 sm:$0xff]   ;;  %v815_v17 = vld [vmem:[%s280_s19] ss:$8 sps:$4 sm:$0xff]  }
  0x11   : > { %494 = vmatprep.mubr.bf16.mxu0 %v817_v11  ;;  %v811_v13 = vld [vmem:[%s964_s1 + $0x48] sm:$0xff]   ;;  %v813_v15 = vld [vmem:[%s964_s1 + $0x40] sm:$0xff]  }
  0x12   : > { %756 = vmatpush3.bf16.msra.mxu0 %v802_v3  ;;  %v812_v14 = vld [vmem:[%s964_s1 + $0x8] sm:$0xff]   ;;  %v814_v16 = vld [vmem:[%s964_s1] sm:$0xff]  }
  0x13   : > { %757 = vmatprep.subr.bf16.mxu0 %v803_v4 }
  0x16   : > { %758 = vmatpush3.bf16.msra.mxu0 %v804_v5 }
  0x17   : > { %759 = vmatprep.subr.bf16.mxu0 %v805_v6 }
  0x1a   : > { %760 = vmatpush3.bf16.msra.mxu0 %v806_v7 }
  0x1b   : > { %761 = vmatprep.subr.bf16.mxu0 %v807_v8 }
  0x1e   : > { %762 = vmatpush3.bf16.msra.mxu0 %v808_v9 }
  0x1f   : > { %763 = vmatprep.subr.bf16.mxu0 %v809_v10 }
  0x22   : > { %764 = vmatpush3.bf16.msra.mxu0 %v810_v12 }
  0x23   : > { %765 = vmatprep.subr.bf16.mxu0 %v811_v13 }
  0x26   : > { %766 = vmatpush3.bf16.msra.mxu0 %v812_v14 }
  0x27   : > { %767 = vmatprep.subr.bf16.mxu0 %v813_v15 }
  0x2a   : > { %768 = vmatpush3.bf16.msra.mxu0 %v814_v16 }
  0x2d   : > { %495 = vmatmul.mubr.bf16.vlgmr.msra.gmra.mxu0 %v815_v17 }
  0xed   : > { %v769_v18 = vpop.f32.mrf.mxu0 }
  0xef   : > { %v770_v19 = vpop.f32.mrf.mxu0 }
  0xf0   : > { %v771_v21 = vadd.f32 %v770_v19, %v769_v18 }
  0xf1   : > { %v772_v20 = vpop.f32.mrf.mxu0 }
  0xf2   : > { %v530_v24 = vmul.f32 %v771_v21, %v771_v21 }
  0xf3   : > { %v773_v22 = vpop.f32.mrf.mxu0 }
  0xf4   : > { %v774_v23 = vadd.f32 %v773_v22, %v772_v20 }
  0xf6   : > { %v751_v25 = vpack.c.bf16 %v774_v23, %v771_v21  ;;  %v522_v26 = vadd.f32 %v774_v23, %v771_v21  ;;  %v531_v27 = vmul.f32 %v774_v23, %v774_v23 }
  0xf8   : > { %752 = vst [vmem:[%s299_s12] sm:$0xff] %v751_v25   ;;  %v523_v28 = vrot.slane %v522_v26, 4  ;;  %v532_v29 = vadd.f32 %v531_v27, %v530_v24 }
  0xfa   : > { %v524_v30 = vadd.f32 %v523_v28, %v522_v26  ;;  %v533_v31 = vrot.slane %v532_v29, 4 }
  0xfc   : > { %v525_v32 = vrot.slane %v524_v30, 2  ;;  %v534_v33 = vadd.f32 %v533_v31, %v532_v29 }
  0xfe   : > { %v526_v34 = vadd.f32 %v525_v32, %v524_v30  ;;  %v535_v35 = vrot.slane %v534_v33, 2 }
 0x100   : > { %v527_v36 = vrot.slane %v526_v34, 1  ;;  %v536_v37 = vadd.f32 %v535_v35, %v534_v33 }
 0x102   : > { %v528_v38 = vadd.f32 %v527_v36, %v526_v34  ;;  %v537_v39 = vrot.slane %v536_v37, 1 }
 0x104   : > { %529 = vst [vmem:[%s306_s14] sm:$0x1] %v528_v38  ;;  %v538_v40 = vadd.f32 %v537_v39, %v536_v37 }
 0x106   : > { %539 = vst [vmem:[%s312_s22] sm:$0x1] %v538_v40 }
 0x107 PF: > { %s15_s17 = sadd.s32 1, %s840_s17   ;;  %s968_s15 = smov %s836_s16 }
 0x108   : > { %p12_p6 = scmp.ge.s32.totalorder %s15_s17, 4   ;;  %s969_s16 = smov %s971_s18 }
 0x10a   :  { %14 = sbr.rel (!%p12_p6) target bundleno = 2 (0x2), region = 93 }

// kernel: _lambda_.8
= control target key start
LH: loop header
LB: loop body
LE: loop exit
PB: predicated region body
PF: predicated region fallthrough
CT: control target
= control target key end

     0   :  { %s1107_s15 = smov 0   ;;  %s1109_s16 = smov 0   ;;  %s1251_s0 = inlined_call_operand.vmem [shape: bf16[32,512], index: 0, kind: input, shape index: {}]   ;;  %s1252_s1 = inlined_call_operand.vmem [shape: bf16[512,128], index: 1, kind: input, shape index: {}]   ;;  %s1253_s2 = inlined_call_operand.vmem [shape: bf16[32,128], index: 2, kind: output, shape index: {0}]   ;;  %s1254_s3 = inlined_call_operand.vmem [shape: f32[2,1,128], index: 3, kind: output, shape index: {1}]   ;;  %s1255_s4 = inlined_call_operand.vmem [shape: f32[2,1,128], index: 4, kind: output, shape index: {2}]  }
   0x1   :  { %s1111_s17 = smov 0  }
   0x2 LB: > { %s34_s18 = sadd.s32 1, %s1076_s16  ;;  %p898_p0 = scmp.ge.s32.totalorder %s1080_s17, 1  ;;  %s1080_s17 = sphi %s1111_s17, %s15_s17   ;;  %s1076_s16 = sphi %s1109_s16, %s1257_s16   ;;  %s1072_s15 = sphi %s1107_s15, %s1256_s15  }
   0x3   : > { %p36_p1 = scmp.ge.s32.totalorder %s34_s18, 2  ;;  %p217_p2 = scmp.lt.s32.totalorder %s1080_s17, 3 }
   0x5   : > { %s1259_s18 = smov (%p36_p1, %s34_s18), 0  ;;  %p218_p3 = pnand %p898_p0, %p217_p2 }
   0x6   : > { %s899_s29 = sshll.u32 (!%p218_p3), %s1072_s15, 1  ;;  %p301_p5 = scmp.lt.s32.totalorder (!%p218_p3), %s1072_s15, 1 }
   0x7   : > { %221 = sbr.rel (%p218_p3) target bundleno = 267 (0x10b), region = 28  ;;  %p273_p4 = scmp.lt.s32.totalorder (!%p218_p3), %s899_s29, 3 }
   0xc   : > { %v1020_v0 = vld [vmem:[%s1252_s1 + $0x78] sm:$0xff]   ;;  %v1024_v4 = vld [vmem:[%s1252_s1 + $0x70] sm:$0xff]   ;;  %v1028_v8 = vld [vmem:[%s1252_s1 + $0x68] sm:$0xff]   ;;  %s1261_s29 = smov (!%p273_p4, %s899_s29), 3  ;;  %s1263_s15 = smov (!%p301_p5, %s1072_s15), 1 }
   0xd   : > { %v1021_v1 = vld [vmem:[%s1252_s1 + $0xf8] sm:$0xff]   ;;  %952 = vmatprep.subr.bf16.mxu0 %v1020_v0  ;;  %v1025_v5 = vld [vmem:[%s1252_s1 + $0xf0] sm:$0xff]   ;;  %v1029_v9 = vld [vmem:[%s1252_s1 + $0xe8] sm:$0xff]   ;;  %s944_s5 = sshll.u32 %s1261_s29, 4  ;;  %s903_s23 = sshll.u32 %s1261_s29, 2 }
   0xe   : > { %v1022_v2 = vld [vmem:[%s1252_s1 + $0x38] sm:$0xff]   ;;  %974 = vmatprep.subr.bf16.mxu1 %v1021_v1  ;;  %v1026_v6 = vld [vmem:[%s1252_s1 + $0x30] sm:$0xff]   ;;  %v1030_v10 = vld [vmem:[%s1252_s1 + $0x28] sm:$0xff]   ;;  %s280_s14 = scalar_lea.vmem %s1251_s0, %s944_s5  ;;  %s299_s26 = scalar_lea.vmem %s1253_s2, %s903_s23 }
   0xf   : > { %v1023_v3 = vld [vmem:[%s1252_s1 + $0xb8] sm:$0xff]   ;;  %953 = vmatpush3.bf16.msra.mxu0 %v1022_v2  ;;  %v1027_v7 = vld [vmem:[%s1252_s1 + $0xb0] sm:$0xff]   ;;  %v1031_v11 = vld [vmem:[%s1252_s1 + $0xa8] sm:$0xff]   ;;  %s306_s28 = scalar_lea.vmem %s1254_s3, %s1263_s15  ;;  %s312_s6 = scalar_lea.vmem %s1255_s4, %s1263_s15 }
  0x10   : > { %975 = vmatpush3.bf16.msra.mxu1 %v1023_v3  ;;  %954 = vmatprep.subr.bf16.mxu0 %v1024_v4  ;;  %v1032_v12 = vld [vmem:[%s1252_s1 + $0x60] sm:$0xff]   ;;  %v1036_v16 = vld [vmem:[%s1252_s1 + $0x58] sm:$0xff]   ;;  %v1040_v20 = vld [vmem:[%s1252_s1 + $0x50] sm:$0xff]  }
  0x11   : > { %976 = vmatprep.subr.bf16.mxu1 %v1025_v5  ;;  %v1033_v13 = vld [vmem:[%s1252_s1 + $0xe0] sm:$0xff]   ;;  %v1037_v17 = vld [vmem:[%s1252_s1 + $0xd8] sm:$0xff]   ;;  %v1041_v21 = vld [vmem:[%s1252_s1 + $0xd0] sm:$0xff]  }
  0x12   : > { %v1034_v14 = vld [vmem:[%s1252_s1 + $0x20] sm:$0xff]   ;;  %v1038_v18 = vld [vmem:[%s1252_s1 + $0x18] sm:$0xff]   ;;  %v1042_v22 = vld [vmem:[%s1252_s1 + $0x10] sm:$0xff]  }
  0x13   : > { %955 = vmatpush3.bf16.msra.mxu0 %v1026_v6  ;;  %v1035_v15 = vld [vmem:[%s1252_s1 + $0xa0] sm:$0xff]   ;;  %v1039_v19 = vld [vmem:[%s1252_s1 + $0x98] sm:$0xff]   ;;  %v1043_v23 = vld [vmem:[%s1252_s1 + $0x90] sm:$0xff]  }
  0x14   : > { %977 = vmatpush3.bf16.msra.mxu1 %v1027_v7  ;;  %956 = vmatprep.subr.bf16.mxu0 %v1028_v8  ;;  %v1044_v24 = vld [vmem:[%s1252_s1 + $0x48] sm:$0xff]   ;;  %v1048_v28 = vld [vmem:[%s1252_s1 + $0x40] sm:$0xff]  }
  0x15   : > { %978 = vmatprep.subr.bf16.mxu1 %v1029_v9  ;;  %v1045_v25 = vld [vmem:[%s1252_s1 + $0xc8] sm:$0xff]   ;;  %v1049_v29 = vld [vmem:[%s1252_s1 + $0xc0] sm:$0xff]  }
  0x16   : > { %v1046_v26 = vld [vmem:[%s1252_s1 + $0x8] sm:$0xff]   ;;  %v1050_v30 = vld [vmem:[%s1252_s1] sm:$0xff]  }
  0x17   : > { %957 = vmatpush3.bf16.msra.mxu0 %v1030_v10  ;;  %v1047_v27 = vld [vmem:[%s1252_s1 + $0x88] sm:$0xff]   ;;  %v1051_v31 = vld [vmem:[%s1252_s1 + $0x80] sm:$0xff]  }
  0x18   : > { %979 = vmatpush3.bf16.msra.mxu1 %v1031_v11  ;;  %958 = vmatprep.subr.bf16.mxu0 %v1032_v12  ;;  %v1052_v32 = vld [vmem:[%s280_s14] ss:$16 sps:$4 sm:$0xff]   ;;  %v1054_v33 = vld [vmem:[%s280_s14 + $0x4] ss:$16 sps:$4 sm:$0xff]   ;;  %v1055_v34 = vld [vmem:[%s280_s14 + $0x8] ss:$16 sps:$4 sm:$0xff]  }
  0x19   : > { %980 = vmatprep.subr.bf16.mxu1 %v1033_v13  ;;  %v1057_v35 = vld [vmem:[%s280_s14 + $0xc] ss:$16 sps:$4 sm:$0xff]   ;;  %634 = vmatprep.mubr.bf16.mxu0 %v1054_v33 }
  0x1a   : > { %675 = vmatprep.mubr.bf16.mxu1 %v1057_v35 }
  0x1b   : > { %959 = vmatpush3.bf16.msra.mxu0 %v1034_v14 }
  0x1c   : > { %981 = vmatpush3.bf16.msra.mxu1 %v1035_v15  ;;  %960 = vmatprep.subr.bf16.mxu0 %v1036_v16 }
  0x1d   : > { %982 = vmatprep.subr.bf16.mxu1 %v1037_v17 }
  0x1f   : > { %961 = vmatpush3.bf16.msra.mxu0 %v1038_v18 }
  0x20   : > { %983 = vmatpush3.bf16.msra.mxu1 %v1039_v19  ;;  %962 = vmatprep.subr.bf16.mxu0 %v1040_v20 }
  0x21   : > { %984 = vmatprep.subr.bf16.mxu1 %v1041_v21 }
  0x23   : > { %963 = vmatpush3.bf16.msra.mxu0 %v1042_v22 }
  0x24   : > { %985 = vmatpush3.bf16.msra.mxu1 %v1043_v23  ;;  %964 = vmatprep.subr.bf16.mxu0 %v1044_v24 }
  0x25   : > { %986 = vmatprep.subr.bf16.mxu1 %v1045_v25 }
  0x27   : > { %965 = vmatpush3.bf16.msra.mxu0 %v1046_v26 }
  0x28   : > { %987 = vmatpush3.bf16.msra.mxu1 %v1047_v27  ;;  %966 = vmatprep.subr.bf16.mxu0 %v1048_v28 }
  0x29   : > { %988 = vmatprep.subr.bf16.mxu1 %v1049_v29 }
  0x2b   : > { %967 = vmatpush3.bf16.msra.mxu0 %v1050_v30 }
  0x2c   : > { %989 = vmatpush3.bf16.msra.mxu1 %v1051_v31 }
  0x2e   : > { %635 = vmatmul.mubr.bf16.vlgmr.msra.gmra.mxu0 %v1052_v32 }
  0x2f   : > { %676 = vmatmul.mubr.bf16.vlgmr.msra.gmra.mxu1 %v1055_v34 }
  0xee   : > { %v968_v36 = vpop.f32.mrf.mxu0 }
  0xef   : > { %v990_v37 = vpop.f32.mrf.mxu1 }
  0xf0   : > { %v969_v38 = vpop.f32.mrf.mxu0 }
  0xf1   : > { %v991_v39 = vpop.f32.mrf.mxu1  ;;  %v970_v40 = vadd.f32 %v969_v38, %v968_v36 }
  0xf2   : > { %v992_v41 = vadd.f32 %v991_v39, %v990_v37  ;;  %v971_v42 = vpop.f32.mrf.mxu0 }
  0xf3   : > { %v993_v43 = vpop.f32.mrf.mxu1 }
  0xf4   : > { %v972_v44 = vpop.f32.mrf.mxu0  ;;  %v678_v47 = vadd.f32 %v992_v41, %v970_v40 }
  0xf5   : > { %v973_v45 = vadd.f32 %v972_v44, %v971_v42  ;;  %v994_v46 = vpop.f32.mrf.mxu1 }
  0xf6   : > { %v995_v48 = vadd.f32 %v994_v46, %v993_v43  ;;  %v711_v50 = vmul.f32 %v678_v47, %v678_v47 }
  0xf8   : > { %v681_v49 = vadd.f32 %v995_v48, %v973_v45 }
  0xfa   : > { %v950_v51 = vpack.c.bf16 %v681_v49, %v678_v47  ;;  %v703_v52 = vadd.f32 %v681_v49, %v678_v47  ;;  %v712_v53 = vmul.f32 %v681_v49, %v681_v49 }
  0xfc   : > { %951 = vst [vmem:[%s299_s26] sm:$0xff] %v950_v51   ;;  %v704_v54 = vrot.slane %v703_v52, 4  ;;  %v713_v55 = vadd.f32 %v712_v53, %v711_v50 }
  0xfe   : > { %v705_v56 = vadd.f32 %v704_v54, %v703_v52  ;;  %v714_v57 = vrot.slane %v713_v55, 4 }
 0x100   : > { %v706_v58 = vrot.slane %v705_v56, 2  ;;  %v715_v59 = vadd.f32 %v714_v57, %v713_v55 }
 0x102   : > { %v707_v60 = vadd.f32 %v706_v58, %v705_v56  ;;  %v716_v61 = vrot.slane %v715_v59, 2 }
 0x104   : > { %v708_v62 = vrot.slane %v707_v60, 1  ;;  %v717_v63 = vadd.f32 %v716_v61, %v715_v59 }
 0x106   : > { %v709_v0 = vadd.f32 %v708_v62, %v707_v60  ;;  %v718_v1 = vrot.slane %v717_v63, 1 }
 0x108   : > { %710 = vst [vmem:[%s306_s28] sm:$0x1] %v709_v0  ;;  %v719_v2 = vadd.f32 %v718_v1, %v717_v63 }
 0x10a   : > { %720 = vst [vmem:[%s312_s6] sm:$0x1] %v719_v2 }
 0x10b PF: > { %s15_s17 = sadd.s32 1, %s1080_s17   ;;  %s1256_s15 = smov %s1076_s16 }
 0x10c   : > { %p12_p6 = scmp.ge.s32.totalorder %s15_s17, 4   ;;  %s1257_s16 = smov %s1259_s18 }
 0x10e   :  { %14 = sbr.rel (!%p12_p6) target bundleno = 2 (0x2), region = 93 }

// kernel: _lambda_.9
= control target key start
LH: loop header
LB: loop body
LE: loop exit
PB: predicated region body
PF: predicated region fallthrough
CT: control target
= control target key end

     0   :  { %s1241_s1 = inlined_call_operand.vmem [shape: bf16[1024,128], index: 1, kind: input, shape index: {}]   ;;  %s1242_s0 = inlined_call_operand.vmem [shape: bf16[16,1024], index: 0, kind: input, shape index: {}]   ;;  %s1243_s2 = inlined_call_operand.vmem [shape: f32[1,128], index: 2, kind: input, shape index: {}]   ;;  %s1244_s3 = inlined_call_operand.vmem [shape: f32[16,128], index: 3, kind: output, shape index: {}]  }
   0x1   :  { %v932_v0 = vld [vmem:[%s1241_s1 + $0x78] sm:$0xff]   ;;  %v936_v4 = vld [vmem:[%s1241_s1 + $0x70] sm:$0xff]   ;;  %v940_v8 = vld [vmem:[%s1241_s1 + $0x68] sm:$0xff]  }
   0x2   :  { %v933_v1 = vld [vmem:[%s1241_s1 + $0xf8] sm:$0xff]   ;;  %844 = vmatprep.subr.bf16.mxu0 %v932_v0  ;;  %v937_v5 = vld [vmem:[%s1241_s1 + $0xf0] sm:$0xff]   ;;  %v941_v9 = vld [vmem:[%s1241_s1 + $0xe8] sm:$0xff]  }
   0x3   :  { %v934_v2 = vld [vmem:[%s1241_s1 + $0x38] sm:$0xff]   ;;  %866 = vmatprep.subr.bf16.mxu1 %v933_v1  ;;  %v938_v6 = vld [vmem:[%s1241_s1 + $0x30] sm:$0xff]   ;;  %v942_v10 = vld [vmem:[%s1241_s1 + $0x28] sm:$0xff]  }
   0x4   :  { %v935_v3 = vld [vmem:[%s1241_s1 + $0xb8] sm:$0xff]   ;;  %845 = vmatpush3.bf16.msra.mxu0 %v934_v2  ;;  %v939_v7 = vld [vmem:[%s1241_s1 + $0xb0] sm:$0xff]   ;;  %v943_v11 = vld [vmem:[%s1241_s1 + $0xa8] sm:$0xff]  }
   0x5   :  { %867 = vmatpush3.bf16.msra.mxu1 %v935_v3  ;;  %846 = vmatprep.subr.bf16.mxu0 %v936_v4  ;;  %v944_v12 = vld [vmem:[%s1241_s1 + $0x60] sm:$0xff]   ;;  %v948_v16 = vld [vmem:[%s1241_s1 + $0x58] sm:$0xff]   ;;  %v952_v20 = vld [vmem:[%s1241_s1 + $0x50] sm:$0xff]  }
   0x6   :  { %868 = vmatprep.subr.bf16.mxu1 %v937_v5  ;;  %v945_v13 = vld [vmem:[%s1241_s1 + $0xe0] sm:$0xff]   ;;  %v949_v17 = vld [vmem:[%s1241_s1 + $0xd8] sm:$0xff]   ;;  %v953_v21 = vld [vmem:[%s1241_s1 + $0xd0] sm:$0xff]  }
   0x7   :  { %v946_v14 = vld [vmem:[%s1241_s1 + $0x20] sm:$0xff]   ;;  %v950_v18 = vld [vmem:[%s1241_s1 + $0x18] sm:$0xff]   ;;  %v954_v22 = vld [vmem:[%s1241_s1 + $0x10] sm:$0xff]  }
   0x8   :  { %847 = vmatpush3.bf16.msra.mxu0 %v938_v6  ;;  %v947_v15 = vld [vmem:[%s1241_s1 + $0xa0] sm:$0xff]   ;;  %v951_v19 = vld [vmem:[%s1241_s1 + $0x98] sm:$0xff]   ;;  %v955_v23 = vld [vmem:[%s1241_s1 + $0x90] sm:$0xff]  }
   0x9   :  { %869 = vmatpush3.bf16.msra.mxu1 %v939_v7  ;;  %848 = vmatprep.subr.bf16.mxu0 %v940_v8  ;;  %v956_v24 = vld [vmem:[%s1241_s1 + $0x48] sm:$0xff]   ;;  %v960_v28 = vld [vmem:[%s1241_s1 + $0x40] sm:$0xff]   ;;  %v964_v40 = vld [vmem:[%s1241_s1 + $0x178] sm:$0xff]  }
   0xa   :  { %870 = vmatprep.subr.bf16.mxu1 %v941_v9  ;;  %v957_v25 = vld [vmem:[%s1241_s1 + $0xc8] sm:$0xff]   ;;  %v961_v29 = vld [vmem:[%s1241_s1 + $0xc0] sm:$0xff]   ;;  %v965_v41 = vld [vmem:[%s1241_s1 + $0x1f8] sm:$0xff]  }
   0xb   :  { %v958_v26 = vld [vmem:[%s1241_s1 + $0x8] sm:$0xff]   ;;  %v962_v30 = vld [vmem:[%s1241_s1] sm:$0xff]   ;;  %v966_v42 = vld [vmem:[%s1241_s1 + $0x138] sm:$0xff]  }
   0xc   :  { %849 = vmatpush3.bf16.msra.mxu0 %v942_v10  ;;  %v959_v27 = vld [vmem:[%s1241_s1 + $0x88] sm:$0xff]   ;;  %v963_v31 = vld [vmem:[%s1241_s1 + $0x80] sm:$0xff]   ;;  %v967_v43 = vld [vmem:[%s1241_s1 + $0x1b8] sm:$0xff]  }
   0xd   :  { %871 = vmatpush3.bf16.msra.mxu1 %v943_v11  ;;  %850 = vmatprep.subr.bf16.mxu0 %v944_v12  ;;  %v23_v32 = vld [vmem:[%s1242_s0] sm:$0xff]  ;;  %v24_v34 = vld [vmem:[%s1242_s0 + $0x8] sm:$0xff]  ;;  %v968_v44 = vld [vmem:[%s1241_s1 + $0x170] sm:$0xff]  }
   0xe   :  { %872 = vmatprep.subr.bf16.mxu1 %v945_v13  ;;  %v27_v33 = vld [vmem:[%s1242_s0 + $0x20] sm:$0xff]  ;;  %v28_v37 = vld [vmem:[%s1242_s0 + $0x28] sm:$0xff]  ;;  %v969_v45 = vld [vmem:[%s1241_s1 + $0x1f0] sm:$0xff]  }
   0xf   :  { %v771_v35 = vcombine.low %v23_v32, %v27_v33  ;;  %v772_v36 = vcombine.high %v23_v32, %v27_v33  ;;  %v773_v38 = vcombine.low %v24_v34, %v28_v37  ;;  %v774_v39 = vcombine.high %v24_v34, %v28_v37  ;;  %v970_v46 = vld [vmem:[%s1241_s1 + $0x130] sm:$0xff]   ;;  %v972_v48 = vld [vmem:[%s1241_s1 + $0x168] sm:$0xff]   ;;  %v976_v52 = vld [vmem:[%s1241_s1 + $0x160] sm:$0xff]  }
  0x10   :  { %851 = vmatpush3.bf16.msra.mxu0 %v946_v14  ;;  %v971_v47 = vld [vmem:[%s1241_s1 + $0x1b0] sm:$0xff]   ;;  %v973_v49 = vld [vmem:[%s1241_s1 + $0x1e8] sm:$0xff]   ;;  %v977_v53 = vld [vmem:[%s1241_s1 + $0x1e0] sm:$0xff]  }
  0x11   :  { %873 = vmatpush3.bf16.msra.mxu1 %v947_v15  ;;  %852 = vmatprep.subr.bf16.mxu0 %v948_v16  ;;  %v974_v50 = vld [vmem:[%s1241_s1 + $0x128] sm:$0xff]   ;;  %v978_v54 = vld [vmem:[%s1241_s1 + $0x120] sm:$0xff]   ;;  %v980_v56 = vld [vmem:[%s1241_s1 + $0x158] sm:$0xff]  }
  0x12   :  { %874 = vmatprep.subr.bf16.mxu1 %v949_v17  ;;  %615 = vmatprep.mubr.bf16.mxu0 %v772_v36  ;;  %v975_v51 = vld [vmem:[%s1241_s1 + $0x1a8] sm:$0xff]   ;;  %v979_v55 = vld [vmem:[%s1241_s1 + $0x1a0] sm:$0xff]   ;;  %v981_v57 = vld [vmem:[%s1241_s1 + $0x1d8] sm:$0xff]  }
  0x13   :  { %656 = vmatprep.mubr.bf16.mxu1 %v774_v39  ;;  %v982_v58 = vld [vmem:[%s1241_s1 + $0x118] sm:$0xff]   ;;  %v984_v60 = vld [vmem:[%s1241_s1 + $0x150] sm:$0xff]   ;;  %v988_v0 = vld [vmem:[%s1241_s1 + $0x148] sm:$0xff]  }
  0x14   :  { %853 = vmatpush3.bf16.msra.mxu0 %v950_v18  ;;  %v983_v59 = vld [vmem:[%s1241_s1 + $0x198] sm:$0xff]   ;;  %v985_v61 = vld [vmem:[%s1241_s1 + $0x1d0] sm:$0xff]   ;;  %v989_v1 = vld [vmem:[%s1241_s1 + $0x1c8] sm:$0xff]  }
  0x15   :  { %875 = vmatpush3.bf16.msra.mxu1 %v951_v19  ;;  %854 = vmatprep.subr.bf16.mxu0 %v952_v20  ;;  %v986_v62 = vld [vmem:[%s1241_s1 + $0x110] sm:$0xff]   ;;  %v990_v2 = vld [vmem:[%s1241_s1 + $0x108] sm:$0xff]   ;;  %v992_v4 = vld [vmem:[%s1241_s1 + $0x140] sm:$0xff]  }
  0x16   :  { %876 = vmatprep.subr.bf16.mxu1 %v953_v21  ;;  %v987_v63 = vld [vmem:[%s1241_s1 + $0x190] sm:$0xff]   ;;  %v991_v3 = vld [vmem:[%s1241_s1 + $0x188] sm:$0xff]   ;;  %v993_v5 = vld [vmem:[%s1241_s1 + $0x1c0] sm:$0xff]  }
  0x17   :  { %v994_v6 = vld [vmem:[%s1241_s1 + $0x100] sm:$0xff]   ;;  %v25_v8 = vld [vmem:[%s1242_s0 + $0x10] sm:$0xff]  ;;  %v26_v12 = vld [vmem:[%s1242_s0 + $0x18] sm:$0xff] }
  0x18   :  { %855 = vmatpush3.bf16.msra.mxu0 %v954_v22  ;;  %v995_v7 = vld [vmem:[%s1241_s1 + $0x180] sm:$0xff]   ;;  %v29_v9 = vld [vmem:[%s1242_s0 + $0x30] sm:$0xff]  ;;  %v30_v13 = vld [vmem:[%s1242_s0 + $0x38] sm:$0xff] }
  0x19   :  { %877 = vmatpush3.bf16.msra.mxu1 %v955_v23  ;;  %856 = vmatprep.subr.bf16.mxu0 %v956_v24  ;;  %v775_v10 = vcombine.low %v25_v8, %v29_v9  ;;  %v776_v11 = vcombine.high %v25_v8, %v29_v9  ;;  %v777_v14 = vcombine.low %v26_v12, %v30_v13 }
  0x1a   :  { %878 = vmatprep.subr.bf16.mxu1 %v957_v25  ;;  %v778_v15 = vcombine.high %v26_v12, %v30_v13 }
  0x1c   :  { %857 = vmatpush3.bf16.msra.mxu0 %v958_v26 }
  0x1d   :  { %879 = vmatpush3.bf16.msra.mxu1 %v959_v27  ;;  %858 = vmatprep.subr.bf16.mxu0 %v960_v28 }
  0x1e   :  { %880 = vmatprep.subr.bf16.mxu1 %v961_v29 }
  0x20   :  { %859 = vmatpush3.bf16.msra.mxu0 %v962_v30 }
  0x21   :  { %881 = vmatpush3.bf16.msra.mxu1 %v963_v31  ;;  %888 = vmatprep.subr.bf16.mxu0 %v964_v40 }
  0x22   :  { %910 = vmatprep.subr.bf16.mxu1 %v965_v41 }
  0x23   :  { %616 = vmatmul.mubr.bf16.vlgmr.msra.gmra.mxu0 %v771_v35 }
  0x24   :  { %657 = vmatmul.mubr.bf16.vlgmr.msra.gmra.mxu1 %v773_v38  ;;  %889 = vmatpush3.bf16.msra.mxu0 %v966_v42  ;;  %v843_v38 = vld [vmem:[%s1243_s2] ss:$0 sm:$0xff] }
  0x25   :  { %911 = vmatpush3.bf16.msra.mxu1 %v967_v43  ;;  %890 = vmatprep.subr.bf16.mxu0 %v968_v44 }
  0x26   :  { %912 = vmatprep.subr.bf16.mxu1 %v969_v45  ;;  %697 = vmatprep.mubr.bf16.mxu0 %v776_v11 }
  0x27   :  { %738 = vmatprep.mubr.bf16.mxu1 %v778_v15 }
  0x28   :  { %891 = vmatpush3.bf16.msra.mxu0 %v970_v46 }
  0x29   :  { %913 = vmatpush3.bf16.msra.mxu1 %v971_v47  ;;  %892 = vmatprep.subr.bf16.mxu0 %v972_v48 }
  0x2a   :  { %914 = vmatprep.subr.bf16.mxu1 %v973_v49 }
  0x2c   :  { %893 = vmatpush3.bf16.msra.mxu0 %v974_v50 }
  0x2d   :  { %915 = vmatpush3.bf16.msra.mxu1 %v975_v51  ;;  %894 = vmatprep.subr.bf16.mxu0 %v976_v52 }
  0x2e   :  { %916 = vmatprep.subr.bf16.mxu1 %v977_v53 }
  0x30   :  { %895 = vmatpush3.bf16.msra.mxu0 %v978_v54 }
  0x31   :  { %917 = vmatpush3.bf16.msra.mxu1 %v979_v55  ;;  %896 = vmatprep.subr.bf16.mxu0 %v980_v56 }
  0x32   :  { %918 = vmatprep.subr.bf16.mxu1 %v981_v57 }
  0x34   :  { %897 = vmatpush3.bf16.msra.mxu0 %v982_v58 }
  0x35   :  { %919 = vmatpush3.bf16.msra.mxu1 %v983_v59  ;;  %898 = vmatprep.subr.bf16.mxu0 %v984_v60 }
  0x36   :  { %920 = vmatprep.subr.bf16.mxu1 %v985_v61 }
  0x38   :  { %899 = vmatpush3.bf16.msra.mxu0 %v986_v62 }
  0x39   :  { %921 = vmatpush3.bf16.msra.mxu1 %v987_v63  ;;  %900 = vmatprep.subr.bf16.mxu0 %v988_v0 }
  0x3a   :  { %922 = vmatprep.subr.bf16.mxu1 %v989_v1 }
  0x3c   :  { %901 = vmatpush3.bf16.msra.mxu0 %v990_v2 }
  0x3d   :  { %923 = vmatpush3.bf16.msra.mxu1 %v991_v3  ;;  %902 = vmatprep.subr.bf16.mxu0 %v992_v4 }
  0x3e   :  { %924 = vmatprep.subr.bf16.mxu1 %v993_v5 }
  0x40   :  { %903 = vmatpush3.bf16.msra.mxu0 %v994_v6 }
  0x41   :  { %925 = vmatpush3.bf16.msra.mxu1 %v995_v7 }
  0x43   :  { %698 = vmatmul.mubr.bf16.vlgmr.msra.gmra.mxu0 %v775_v10 }
  0x44   :  { %739 = vmatmul.mubr.bf16.vlgmr.msra.gmra.mxu1 %v777_v14 }
  0xe3   :  { %v860_v16 = vpop.f32.mrf.mxu0 }
  0xe4   :  { %v882_v17 = vpop.f32.mrf.mxu1 }
  0xe5   :  { %v861_v18 = vpop.f32.mrf.mxu0 }
  0xe6   :  { %v883_v19 = vpop.f32.mrf.mxu1  ;;  %v862_v23 = vadd.f32 %v861_v18, %v860_v16 }
  0xe7   :  { %v863_v20 = vpop.f32.mrf.mxu0  ;;  %v884_v24 = vadd.f32 %v883_v19, %v882_v17 }
  0xe8   :  { %v885_v21 = vpop.f32.mrf.mxu1 }
  0xe9   :  { %v864_v22 = vpop.f32.mrf.mxu0  ;;  %v659_v29 = vadd.f32 %v884_v24, %v862_v23 }
  0xea   :  { %v886_v25 = vpop.f32.mrf.mxu1  ;;  %v865_v30 = vadd.f32 %v864_v22, %v863_v20 }
  0xeb   :  { %v887_v31 = vadd.f32 %v886_v25, %v885_v21 }
  0xed   :  { %v662_v40 = vadd.f32 %v887_v31, %v865_v30 }
 0x103   :  { %v904_v26 = vpop.f32.mrf.mxu0 }
 0x104   :  { %v926_v27 = vpop.f32.mrf.mxu1 }
 0x105   :  { %v905_v28 = vpop.f32.mrf.mxu0 }
 0x106   :  { %v906_v32 = vadd.f32 %v905_v28, %v904_v26  ;;  %v927_v33 = vpop.f32.mrf.mxu1 }
 0x107   :  { %v907_v34 = vpop.f32.mrf.mxu0  ;;  %v928_v36 = vadd.f32 %v927_v33, %v926_v27 }
 0x108   :  { %v700_v35 = vadd.f32 %v906_v32, %v659_v29  ;;  %v929_v37 = vpop.f32.mrf.mxu1 }
 0x109   :  { %v908_v39 = vpop.f32.mrf.mxu0 }
 0x10a   :  { %v741_v41 = vadd.f32 %v928_v36, %v700_v35  ;;  %v909_v42 = vadd.f32 %v908_v39, %v907_v34  ;;  %v930_v43 = vpop.f32.mrf.mxu1 }
 0x10b   :  { %v931_v46 = vadd.f32 %v930_v43, %v929_v37 }
 0x10c   :  { %v763_v44 = vadd.f32 %v843_v38, %v741_v41  ;;  %v703_v45 = vadd.f32 %v909_v42, %v662_v40 }
 0x10e   :  { %765 = vst [vmem:[%s1244_s3] sm:$0xff] %v763_v44  ;;  %v744_v47 = vadd.f32 %v931_v46, %v703_v45 }
 0x110   :  { %v764_v48 = vadd.f32 %v843_v38, %v744_v47 }
 0x112   :  { %766 = vst [vmem:[%s1244_s3 + $0x8] sm:$0xff] %v764_v48 }

</bundles_post_ra>
